<compile_context>
chip_gen: v7x
topology: tpu7x:2x2x1
jax: 0.10.0
libtpu: 0.0.40
codegen_flags: <defaults>
</compile_context>

<pallas_src>
import functools
import math

import jax
import jax.numpy as jnp
from jax.experimental import pallas as pl
from jax.experimental.pallas import tpu as pltpu


# ---------------------------------------------------------------------------
# helpers usable both inside kernels and in the pure-JAX reference
# ---------------------------------------------------------------------------
def _layer_norm(x, gamma, beta, eps=1e-12):
    mu = jnp.mean(x, axis=-1, keepdims=True)
    var = jnp.mean((x - mu) ** 2, axis=-1, keepdims=True)
    return (x - mu) * jax.lax.rsqrt(var + eps) * gamma + beta


def _gelu(x):
    # tanh approximation of GELU (BERT-style)
    return 0.5 * x * (1.0 + jnp.tanh(0.7978845608028654 * (x + 0.044715 * x * x * x)))


# ---------------------------------------------------------------------------
# Pallas kernel 1: full BERT encoder (all layers fused, grid over layers)
# ---------------------------------------------------------------------------
def bert_encoder_kernel(n_heads,
                        x_ref, mask_ref,
                        wqkv_ref, bqkv_ref, wo_ref, bo_ref,
                        ln1g_ref, ln1b_ref,
                        w1_ref, b1_ref, w2_ref, b2_ref,
                        ln2g_ref, ln2b_ref,
                        out_ref,
                        act_ref, ctx_ref):
    l = pl.program_id(1)

    # first layer of this batch tile: load the embedding output into the
    # resident activation scratch
    @pl.when(l == 0)
    def _():
        act_ref[...] = x_ref[...]

    x = act_ref[...]                                   # [Bt, S, H] f32 residual stream
    Bt, S, H = x.shape
    d = H // n_heads
    scale = 1.0 / math.sqrt(d)

    # additive attention bias from the padding mask (computed once per step,
    # not per head)
    mask = mask_ref[...]                               # [Bt, S]  (1 = keep, 0 = pad)
    bias = ((1.0 - mask) * (-1e9))[:, None, :]         # [Bt, 1, S]

    # ---------------- self-attention ----------------
    x2 = x.reshape(Bt * S, H)
    xb = x2.astype(jnp.bfloat16)
    qkv = jnp.dot(xb, wqkv_ref[0],
                  preferred_element_type=jnp.float32) + bqkv_ref[0]   # [Bt*S, 3H] f32
    q = qkv[:, :H].reshape(Bt, S, H)
    k = qkv[:, H:2 * H].reshape(Bt, S, H)
    v = qkv[:, 2 * H:].reshape(Bt, S, H)

    for h in range(n_heads):                           # static loop over heads
        sl = slice(h * d, (h + 1) * d)
        qh = q[:, :, sl].astype(jnp.bfloat16)
        kh = k[:, :, sl].astype(jnp.bfloat16)
        vh = v[:, :, sl].astype(jnp.bfloat16)
        # batched scores, contracting on d (no explicit transpose)
        s = jnp.einsum("bqd,bkd->bqk", qh, kh,
                       preferred_element_type=jnp.float32) * scale + bias
        s = s - jnp.max(s, axis=-1, keepdims=True)
        p = jnp.exp(s)
        p = p * pl.reciprocal(jnp.sum(p, axis=-1, keepdims=True), approx=True)
        # write this head's context directly into the [Bt, S, H] scratch slab
        ctx_ref[:, :, sl] = jnp.einsum("bqk,bkd->bqd",
                                       p.astype(jnp.bfloat16), vh,
                                       preferred_element_type=jnp.float32)

    ctx = ctx_ref[...].reshape(Bt * S, H).astype(jnp.bfloat16)
    attn = jnp.dot(ctx, wo_ref[0],
                   preferred_element_type=jnp.float32) + bo_ref[0]     # [Bt*S, H]
    h1 = _layer_norm(x2 + attn, ln1g_ref[0], ln1b_ref[0])              # f32

    # ---------------- feed-forward ----------------
    ff = jnp.dot(h1.astype(jnp.bfloat16), w1_ref[0],
                 preferred_element_type=jnp.float32) + b1_ref[0]
    ff = _gelu(ff)
    ff = jnp.dot(ff.astype(jnp.bfloat16), w2_ref[0],
                 preferred_element_type=jnp.float32) + b2_ref[0]
    h2 = _layer_norm(h1 + ff, ln2g_ref[0], ln2b_ref[0]).reshape(Bt, S, H)

    act_ref[...] = h2

    @pl.when(l == pl.num_programs(1) - 1)
    def _():
        out_ref[...] = h2


def _stack_layer_params(layers):
    """Stack per-layer params along a leading L axis; matmul weights -> bf16."""
    stacked = {}
    for name in ("wqkv", "wo", "w1", "w2"):
        stacked[name] = jnp.stack([lp[name] for lp in layers]).astype(jnp.bfloat16)
    for name in ("bqkv", "bo", "ln1g", "ln1b", "b1", "b2", "ln2g", "ln2b"):
        stacked[name] = jnp.stack([lp[name] for lp in layers])       # f32
    return stacked


def bert_encoder(x, maskf, stacked, n_heads, batch_tile=None):
    B, S, H = x.shape
    L = stacked["wqkv"].shape[0]
    Bt = B if batch_tile is None else batch_tile     # demo: whole batch per step
    assert B % Bt == 0

    names = ["wqkv", "bqkv", "wo", "bo", "ln1g", "ln1b",
             "w1", "b1", "w2", "b2", "ln2g", "ln2b"]
    ws = [stacked[n] for n in names]

    def wspec(a):                                    # one layer slice per grid step
        return pl.BlockSpec((1,) + a.shape[1:], lambda b, l: (l, 0, 0))

    return pl.pallas_call(
        functools.partial(bert_encoder_kernel, n_heads),
        out_shape=jax.ShapeDtypeStruct((B, S, H), jnp.float32),
        grid_spec=pltpu.PrefetchScalarGridSpec(
            num_scalar_prefetch=0,
            grid=(B // Bt, L),
            in_specs=[pl.BlockSpec((Bt, S, H), lambda b, l: (b, 0, 0)),
                      pl.BlockSpec((Bt, S), lambda b, l: (b, 0))]
                     + [wspec(w) for w in ws],
            out_specs=pl.BlockSpec((Bt, S, H), lambda b, l: (b, 0, 0)),
            scratch_shapes=[pltpu.VMEM((Bt, S, H), jnp.float32),   # resident activation
                            pltpu.VMEM((Bt, S, H), jnp.float32)]), # per-layer context slab
        compiler_params=pltpu.CompilerParams(
            dimension_semantics=("parallel", "arbitrary"),
            vmem_limit_bytes=64 * 1024 * 1024),
    )(x, maskf, *ws)


# ---------------------------------------------------------------------------
# Pallas kernel 2: TextCNN head (conv_and_pool for every filter size + fc)
# ---------------------------------------------------------------------------
def cnn_head_kernel(filter_sizes, x_ref, *refs):
    n = len(filter_sizes)
    conv_refs = refs[:2 * n]
    wfc_ref, bfc_ref = refs[2 * n], refs[2 * n + 1]
    out_ref = refs[-1]

    x = x_ref[0]                       # [S, H] f32
    S, H = x.shape
    xb = x.astype(jnp.bfloat16)
    F = conv_refs[0].shape[2]

    wfc = wfc_ref[...]                 # [n*F, C] bf16 (tiny; load once)
    out = bfc_ref[...]                 # [1, C] f32

    for i, ksz in enumerate(filter_sizes):
        w_ref, b_ref = conv_refs[2 * i], conv_refs[2 * i + 1]   # [k, H, F] bf16, [1, F] f32
        L = S - ksz + 1
        # conv as a sum of k shifted matmuls (no im2col buffer), f32 accumulation
        acc = jnp.zeros((L, F), jnp.float32)
        for j in range(ksz):
            acc = acc + jnp.dot(xb[j:j + L, :], w_ref[j],
                                preferred_element_type=jnp.float32)
        y = jnp.maximum(acc + b_ref[...], 0.0)          # bias + ReLU
        fi = jnp.max(y, axis=0, keepdims=True)          # max_pool1d over full length -> [1, F]
        # dropout is identity in eval mode; accumulate the fc contribution of
        # this filter size (avoids feature concatenation)
        out = out + jnp.dot(fi.astype(jnp.bfloat16), wfc[i * F:(i + 1) * F, :],
                            preferred_element_type=jnp.float32)

    out_ref[...] = out


def _full_spec(a):
    # whole-array block, same block for every grid step
    return pl.BlockSpec(a.shape, lambda *_, n=a.ndim: (0,) * n)


def cnn_head(enc, conv_ws, conv_bs, wfc, bfc, filter_sizes):
    B, S, H = enc.shape
    C = wfc.shape[1]
    weights = []
    for w, b in zip(conv_ws, conv_bs):
        weights += [w, b]
    weights += [wfc, bfc]
    return pl.pallas_call(
        functools.partial(cnn_head_kernel, tuple(filter_sizes)),
        out_shape=jax.ShapeDtypeStruct((B, C), jnp.float32),
        grid_spec=pltpu.PrefetchScalarGridSpec(
            num_scalar_prefetch=0,
            grid=(B,),
            in_specs=[pl.BlockSpec((1, S, H), lambda b: (b, 0, 0))]
                     + [_full_spec(w) for w in weights],
            out_specs=pl.BlockSpec((1, C), lambda b: (b, 0))),
        compiler_params=pltpu.CompilerParams(dimension_semantics=("parallel",)),
    )(enc, *weights)


# ---------------------------------------------------------------------------
# parameter init (deterministic, synthetic — no checkpoint loading)
# ---------------------------------------------------------------------------
def init_params(key, cfg):
    H, I, V, S = cfg["hidden"], cfg["intermediate"], cfg["vocab"], cfg["seq"]
    keys = iter(jax.random.split(key, 64))

    def nrm(shape, std=0.02):
        return jax.random.normal(next(keys), shape, jnp.float32) * std

    params = {
        "tok_emb": nrm((V, H)),
        "pos_emb": nrm((S, H)),
        "seg_emb": nrm((2, H)),
        "emb_ln_g": jnp.ones((H,), jnp.float32),
        "emb_ln_b": jnp.zeros((H,), jnp.float32),
        "layers": [],
    }
    for _ in range(cfg["n_layers"]):
        params["layers"].append({
            "wqkv": nrm((H, 3 * H)), "bqkv": jnp.zeros((1, 3 * H), jnp.float32),
            "wo": nrm((H, H)),       "bo": jnp.zeros((1, H), jnp.float32),
            "ln1g": jnp.ones((1, H), jnp.float32), "ln1b": jnp.zeros((1, H), jnp.float32),
            "w1": nrm((H, I)),       "b1": jnp.zeros((1, I), jnp.float32),
            "w2": nrm((I, H)),       "b2": jnp.zeros((1, H), jnp.float32),
            "ln2g": jnp.ones((1, H), jnp.float32), "ln2b": jnp.zeros((1, H), jnp.float32),
        })
    F = cfg["num_filters"]
    params["convs"] = []
    for ksz in cfg["filter_sizes"]:
        w = nrm((F, 1, ksz, H), std=0.1)   # PyTorch Conv2d weight layout [F, 1, k, H]
        b = nrm((F,), std=0.1)
        params["convs"].append((w, b))
    C = cfg["num_classes"]
    params["fc_w"] = nrm((C, F * len(cfg["filter_sizes"])), std=0.1)  # Linear weight [C, in]
    params["fc_b"] = jnp.zeros((C,), jnp.float32)
    return params


# ---------------------------------------------------------------------------
# full forward (Pallas) and pure-JAX reference
# ---------------------------------------------------------------------------
def _embed(params, context):
    B, S = context.shape
    tok = params["tok_emb"][context]                  # gather stays in plain JAX glue
    pos = params["pos_emb"][None, :S, :]
    seg = params["seg_emb"][0][None, None, :]         # all segment ids are 0
    return _layer_norm(tok + pos + seg, params["emb_ln_g"], params["emb_ln_b"])


def _cnn_weights_kernel(params, cfg):
    """Conv weights as [k, H, F] bf16 (sum-of-shifted-matmuls layout) + bf16 fc."""
    F, H = cfg["num_filters"], cfg["hidden"]
    conv_ws, conv_bs = [], []
    for (w, b), ksz in zip(params["convs"], cfg["filter_sizes"]):
        conv_ws.append(w.reshape(F, ksz, H).transpose(1, 2, 0).astype(jnp.bfloat16))
        conv_bs.append(b.reshape(1, F))
    wfc = params["fc_w"].T.astype(jnp.bfloat16)       # [n*F, C]
    bfc = params["fc_b"].reshape(1, -1)
    return conv_ws, conv_bs, wfc, bfc


def _cnn_weights_ref(params, cfg):
    """f32 im2col-layout weights for the pure-JAX reference."""
    F, H = cfg["num_filters"], cfg["hidden"]
    conv_ws, conv_bs = [], []
    for (w, b), ksz in zip(params["convs"], cfg["filter_sizes"]):
        conv_ws.append(w.reshape(F, ksz * H).T)       # [k*H, F]
        conv_bs.append(b.reshape(1, F))
    return conv_ws, conv_bs, params["fc_w"].T, params["fc_b"].reshape(1, -1)


def forward(params, cfg, context, mask):
    x = _embed(params, context)
    maskf = mask.astype(jnp.float32)
    stacked = _stack_layer_params(params["layers"])
    x = bert_encoder(x, maskf, stacked, cfg["n_heads"])                   # Pallas
    conv_ws, conv_bs, wfc, bfc = _cnn_weights_kernel(params, cfg)
    return cnn_head(x, conv_ws, conv_bs, wfc, bfc, cfg["filter_sizes"])   # Pallas


def forward_ref(params, cfg, context, mask):
    x = _embed(params, context)
    maskf = mask.astype(jnp.float32)
    H, n_heads = cfg["hidden"], cfg["n_heads"]
    d = H // n_heads
    for lp in params["layers"]:
        bias = (1.0 - maskf)[:, None, :] * (-1e9)
        qkv = x @ lp["wqkv"] + lp["bqkv"]
        q, k, v = qkv[..., :H], qkv[..., H:2 * H], qkv[..., 2 * H:]
        ctx = []
        for h in range(n_heads):
            sl = slice(h * d, (h + 1) * d)
            s = jnp.einsum("bqd,bkd->bqk", q[..., sl], k[..., sl]) / math.sqrt(d) + bias
            p = jax.nn.softmax(s, axis=-1)
            ctx.append(jnp.einsum("bqk,bkd->bqd", p, v[..., sl]))
        ctx = jnp.concatenate(ctx, axis=-1)
        attn = ctx @ lp["wo"] + lp["bo"]
        h1 = _layer_norm(x + attn, lp["ln1g"], lp["ln1b"])
        ff = _gelu(h1 @ lp["w1"] + lp["b1"]) @ lp["w2"] + lp["b2"]
        x = _layer_norm(h1 + ff, lp["ln2g"], lp["ln2b"])
    conv_ws, conv_bs, wfc, bfc = _cnn_weights_ref(params, cfg)
    S = x.shape[1]
    feats = []
    for (w, b), ksz in zip(zip(conv_ws, conv_bs), cfg["filter_sizes"]):
        L = S - ksz + 1
        unf = jnp.concatenate([x[:, j:j + L, :] for j in range(ksz)], axis=-1)
        y = jnp.maximum(unf @ w + b, 0.0)
        feats.append(jnp.max(y, axis=1))
    return jnp.concatenate(feats, axis=-1) @ wfc + bfc


# ---------------------------------------------------------------------------
if __name__ == "__main__":
    cfg = dict(vocab=50, hidden=32, seq=8, n_heads=4, n_layers=2, intermediate=64,
               num_filters=8, filter_sizes=(2, 3, 4), num_classes=4, batch=2)

    key = jax.random.PRNGKey(0)
    pkey, dkey = jax.random.split(key)
    params = init_params(pkey, cfg)

    context = jax.random.randint(dkey, (cfg["batch"], cfg["seq"]), 0, cfg["vocab"],
                                 dtype=jnp.int32)
    mask = jnp.ones((cfg["batch"], cfg["seq"]), jnp.float32).at[1, 6:].set(0.0)
    # mimic the PyTorch dataloader tuple: x = (context, seq_len, mask); x[1] unused
    x_in = (context, None, mask)

    out = forward(params, cfg, x_in[0], x_in[2])
    out = jax.block_until_ready(out)

    with jax.default_matmul_precision("highest"):
        ref = forward_ref(params, cfg, x_in[0], x_in[2])
    ref = jax.block_until_ready(ref)

    assert out.shape == (cfg["batch"], cfg["num_classes"])
    # bf16 MXU operands vs. the f32 reference -> slightly looser tolerance
    assert bool(jnp.allclose(out, ref, atol=3e-2, rtol=3e-2)), (
        "max abs diff %f" % float(jnp.max(jnp.abs(out - ref))))

    print("KERNEL_OK")
</pallas_src>

<mosaic_0001>
module attributes {stable_mosaic.version = 11 : i64} {
  func.func @bert_encoder_kernel(%arg0: i32, %arg1: i32, %arg2: memref<2x8x32xf32, #tpu.memory_space<vmem>>, %arg3: memref<2x8xf32, #tpu.memory_space<vmem>>, %arg4: memref<1x32x96xbf16, #tpu.memory_space<vmem>>, %arg5: memref<1x1x96xf32, #tpu.memory_space<vmem>>, %arg6: memref<1x32x32xbf16, #tpu.memory_space<vmem>>, %arg7: memref<1x1x32xf32, #tpu.memory_space<vmem>>, %arg8: memref<1x1x32xf32, #tpu.memory_space<vmem>>, %arg9: memref<1x1x32xf32, #tpu.memory_space<vmem>>, %arg10: memref<1x32x64xbf16, #tpu.memory_space<vmem>>, %arg11: memref<1x1x64xf32, #tpu.memory_space<vmem>>, %arg12: memref<1x64x32xbf16, #tpu.memory_space<vmem>>, %arg13: memref<1x1x32xf32, #tpu.memory_space<vmem>>, %arg14: memref<1x1x32xf32, #tpu.memory_space<vmem>>, %arg15: memref<1x1x32xf32, #tpu.memory_space<vmem>>, %arg16: memref<2x8x32xf32, #tpu.memory_space<vmem>>, %arg17: memref<2x8x32xf32, #tpu.memory_space<vmem>>, %arg18: memref<2x8x32xf32, #tpu.memory_space<vmem>>) attributes {dimension_semantics = [#tpu.dimension_semantics<parallel>, #tpu.dimension_semantics<arbitrary>], iteration_bounds = array<i64: 1, 2>, scalar_prefetch = 0 : i64, scratch_operands = 2 : i64, tpu.core_type = #tpu.core_type<tc>, window_params = [{transform_indices = @transform_0, window_bounds = array<i64: 2, 8, 32>}, {transform_indices = @transform_1, window_bounds = array<i64: 2, 8>}, {transform_indices = @transform_2, window_bounds = array<i64: 1, 32, 96>}, {transform_indices = @transform_3, window_bounds = array<i64: 1, 1, 96>}, {transform_indices = @transform_4, window_bounds = array<i64: 1, 32, 32>}, {transform_indices = @transform_5, window_bounds = array<i64: 1, 1, 32>}, {transform_indices = @transform_6, window_bounds = array<i64: 1, 1, 32>}, {transform_indices = @transform_7, window_bounds = array<i64: 1, 1, 32>}, {transform_indices = @transform_8, window_bounds = array<i64: 1, 32, 64>}, {transform_indices = @transform_9, window_bounds = array<i64: 1, 1, 64>}, {transform_indices = @transform_10, window_bounds = array<i64: 1, 64, 32>}, {transform_indices = @transform_11, window_bounds = array<i64: 1, 1, 32>}, {transform_indices = @transform_12, window_bounds = array<i64: 1, 1, 32>}, {transform_indices = @transform_13, window_bounds = array<i64: 1, 1, 32>}, {transform_indices = @transform_14, window_bounds = array<i64: 2, 8, 32>}]} {
    %c0_i32 = arith.constant 0 : i32
    %0 = arith.cmpi eq, %arg1, %c0_i32 : i32
    %1 = arith.extui %0 : i1 to i32
    %c0_i32_0 = arith.constant 0 : i32
    %2 = arith.cmpi ne, %1, %c0_i32_0 : i32
    scf.if %2 {
      %c0_96 = arith.constant 0 : index
      %c0_97 = arith.constant 0 : index
      %c0_98 = arith.constant 0 : index
      %219 = vector.load %arg2[%c0_96, %c0_97, %c0_98] : memref<2x8x32xf32, #tpu.memory_space<vmem>>, vector<2x8x32xf32>
      %c0_99 = arith.constant 0 : index
      %c0_100 = arith.constant 0 : index
      %c0_101 = arith.constant 0 : index
      %220 = vector.load %arg17[%c0_99, %c0_100, %c0_101] : memref<2x8x32xf32, #tpu.memory_space<vmem>>, vector<2x8x32xf32>
      tpu.vector_store %arg17[%c0_99, %c0_100, %c0_101], %219 {strides = array<i32>} : memref<2x8x32xf32, #tpu.memory_space<vmem>>, vector<2x8x32xf32>,
    } else {
    }
    %c0 = arith.constant 0 : index
    %c0_1 = arith.constant 0 : index
    %c0_2 = arith.constant 0 : index
    %3 = vector.load %arg17[%c0, %c0_1, %c0_2] : memref<2x8x32xf32, #tpu.memory_space<vmem>>, vector<2x8x32xf32>
    %c0_3 = arith.constant 0 : index
    %c0_4 = arith.constant 0 : index
    %4 = vector.load %arg3[%c0_3, %c0_4] : memref<2x8xf32, #tpu.memory_space<vmem>>, vector<2x8xf32>
    %cst = arith.constant 1.000000e+00 : f32
    %5 = vector.broadcast %cst : f32 to vector<2x8xf32>
    %6 = arith.subf %5, %4 : vector<2x8xf32>
    %cst_5 = arith.constant -1.000000e+09 : f32
    %7 = vector.broadcast %cst_5 : f32 to vector<2x8xf32>
    %8 = arith.mulf %6, %7 : vector<2x8xf32>
    %9 = vector.shape_cast %8 : vector<2x8xf32> to vector<2x1x8xf32>
    %10 = vector.shape_cast %3 : vector<2x8x32xf32> to vector<16x32xf32>
    %11 = arith.truncf %10 : vector<16x32xf32> to vector<16x32xbf16>
    %c0_6 = arith.constant 0 : index
    %c0_7 = arith.constant 0 : index
    %c0_8 = arith.constant 0 : index
    %12 = vector.load %arg4[%c0_6, %c0_7, %c0_8] : memref<1x32x96xbf16, #tpu.memory_space<vmem>>, vector<1x32x96xbf16>
    %13 = vector.shape_cast %12 : vector<1x32x96xbf16> to vector<32x96xbf16>
    %cst_9 = arith.constant dense<0.000000e+00> : vector<16x96xf32>
    %14 = tpu.matmul %11, %13, %cst_9 {dimension_numbers = #tpu.dot_dimension_numbers<[1], [0], [0], [1], [0, 0, 1, 1], [], []>} : vector<16x32xbf16>, vector<32x96xbf16>, vector<16x96xf32> -> vector<16x96xf32>
    %c0_10 = arith.constant 0 : index
    %c0_11 = arith.constant 0 : index
    %c0_12 = arith.constant 0 : index
    %15 = vector.load %arg5[%c0_10, %c0_11, %c0_12] : memref<1x1x96xf32, #tpu.memory_space<vmem>>, vector<1x1x96xf32>
    %16 = vector.shape_cast %15 : vector<1x1x96xf32> to vector<1x96xf32>
    %17 = vector.broadcast %16 : vector<1x96xf32> to vector<16x96xf32>
    %18 = arith.addf %14, %17 : vector<16x96xf32>
    %19 = vector.extract_strided_slice %18 {offsets = [0, 0], sizes = [16, 32], strides = [1, 1]} : vector<16x96xf32> to vector<16x32xf32>
    %20 = vector.shape_cast %19 : vector<16x32xf32> to vector<2x8x32xf32>
    %21 = vector.extract_strided_slice %18 {offsets = [0, 32], sizes = [16, 32], strides = [1, 1]} : vector<16x96xf32> to vector<16x32xf32>
    %22 = vector.shape_cast %21 : vector<16x32xf32> to vector<2x8x32xf32>
    %23 = vector.extract_strided_slice %18 {offsets = [0, 64], sizes = [16, 32], strides = [1, 1]} : vector<16x96xf32> to vector<16x32xf32>
    %24 = vector.shape_cast %23 : vector<16x32xf32> to vector<2x8x32xf32>
    %25 = vector.extract_strided_slice %20 {offsets = [0, 0, 0], sizes = [2, 8, 8], strides = [1, 1, 1]} : vector<2x8x32xf32> to vector<2x8x8xf32>
    %26 = arith.truncf %25 : vector<2x8x8xf32> to vector<2x8x8xbf16>
    %27 = vector.extract_strided_slice %22 {offsets = [0, 0, 0], sizes = [2, 8, 8], strides = [1, 1, 1]} : vector<2x8x32xf32> to vector<2x8x8xf32>
    %28 = arith.truncf %27 : vector<2x8x8xf32> to vector<2x8x8xbf16>
    %29 = vector.extract_strided_slice %24 {offsets = [0, 0, 0], sizes = [2, 8, 8], strides = [1, 1, 1]} : vector<2x8x32xf32> to vector<2x8x8xf32>
    %30 = arith.truncf %29 : vector<2x8x8xf32> to vector<2x8x8xbf16>
    "tpu.trace_start"() <{level = 10 : i32, message = "bqd,bkd->bqk"}> : () -> ()
    %cst_13 = arith.constant dense<0.000000e+00> : vector<2x8x8xf32>
    %31 = tpu.matmul %26, %28, %cst_13 {dimension_numbers = #tpu.dot_dimension_numbers<[2], [2], [1], [1], [0, 0, 0, 1, 1, 1], [0], [0]>} : vector<2x8x8xbf16>, vector<2x8x8xbf16>, vector<2x8x8xf32> -> vector<2x8x8xf32>
    "tpu.trace_stop"() : () -> ()
    %cst_14 = arith.constant 0.353553385 : f32
    %32 = vector.broadcast %cst_14 : f32 to vector<2x8x8xf32>
    %33 = arith.mulf %31, %32 : vector<2x8x8xf32>
    %34 = vector.broadcast %9 : vector<2x1x8xf32> to vector<2x8x8xf32>
    %35 = arith.addf %33, %34 : vector<2x8x8xf32>
    %cst_15 = arith.constant dense<0xFF800000> : vector<2x8xf32>
    %36 = vector.multi_reduction <maximumf>, %35, %cst_15 [2] : vector<2x8x8xf32> to vector<2x8xf32>
    %37 = vector.shape_cast %36 : vector<2x8xf32> to vector<2x8x1xf32>
    %38 = vector.broadcast %37 : vector<2x8x1xf32> to vector<2x8x8xf32>
    %39 = arith.subf %35, %38 : vector<2x8x8xf32>
    %40 = math.exp %39 : vector<2x8x8xf32>
    %cst_16 = arith.constant dense<0.000000e+00> : vector<2x8xf32>
    %41 = vector.multi_reduction <add>, %40, %cst_16 [2] : vector<2x8x8xf32> to vector<2x8xf32>
    %42 = vector.shape_cast %41 : vector<2x8xf32> to vector<2x8x1xf32>
    %43 = tpu.reciprocal %42 {approx = true} : vector<2x8x1xf32> -> vector<2x8x1xf32>
    %44 = vector.broadcast %43 : vector<2x8x1xf32> to vector<2x8x8xf32>
    %45 = arith.mulf %40, %44 : vector<2x8x8xf32>
    %46 = arith.truncf %45 : vector<2x8x8xf32> to vector<2x8x8xbf16>
    "tpu.trace_start"() <{level = 10 : i32, message = "bqk,bkd->bqd"}> : () -> ()
    %cst_17 = arith.constant dense<0.000000e+00> : vector<2x8x8xf32>
    %47 = tpu.matmul %46, %30, %cst_17 {dimension_numbers = #tpu.dot_dimension_numbers<[2], [1], [1], [2], [0, 0, 0, 1, 1, 2], [0], [0]>} : vector<2x8x8xbf16>, vector<2x8x8xbf16>, vector<2x8x8xf32> -> vector<2x8x8xf32>
    "tpu.trace_stop"() : () -> ()
    %c0_18 = arith.constant 0 : index
    %c0_19 = arith.constant 0 : index
    %c0_20 = arith.constant 0 : index
    %48 = vector.load %arg18[%c0_18, %c0_19, %c0_20] : memref<2x8x32xf32, #tpu.memory_space<vmem>>, vector<2x8x8xf32>
    tpu.vector_store %arg18[%c0_18, %c0_19, %c0_20], %47 {strides = array<i32>} : memref<2x8x32xf32, #tpu.memory_space<vmem>>, vector<2x8x8xf32>,
    %49 = vector.extract_strided_slice %20 {offsets = [0, 0, 8], sizes = [2, 8, 8], strides = [1, 1, 1]} : vector<2x8x32xf32> to vector<2x8x8xf32>
    %50 = arith.truncf %49 : vector<2x8x8xf32> to vector<2x8x8xbf16>
    %51 = vector.extract_strided_slice %22 {offsets = [0, 0, 8], sizes = [2, 8, 8], strides = [1, 1, 1]} : vector<2x8x32xf32> to vector<2x8x8xf32>
    %52 = arith.truncf %51 : vector<2x8x8xf32> to vector<2x8x8xbf16>
    %53 = vector.extract_strided_slice %24 {offsets = [0, 0, 8], sizes = [2, 8, 8], strides = [1, 1, 1]} : vector<2x8x32xf32> to vector<2x8x8xf32>
    %54 = arith.truncf %53 : vector<2x8x8xf32> to vector<2x8x8xbf16>
    "tpu.trace_start"() <{level = 10 : i32, message = "bqd,bkd->bqk"}> : () -> ()
    %cst_21 = arith.constant dense<0.000000e+00> : vector<2x8x8xf32>
    %55 = tpu.matmul %50, %52, %cst_21 {dimension_numbers = #tpu.dot_dimension_numbers<[2], [2], [1], [1], [0, 0, 0, 1, 1, 1], [0], [0]>} : vector<2x8x8xbf16>, vector<2x8x8xbf16>, vector<2x8x8xf32> -> vector<2x8x8xf32>
    "tpu.trace_stop"() : () -> ()
    %cst_22 = arith.constant 0.353553385 : f32
    %56 = vector.broadcast %cst_22 : f32 to vector<2x8x8xf32>
    %57 = arith.mulf %55, %56 : vector<2x8x8xf32>
    %58 = vector.broadcast %9 : vector<2x1x8xf32> to vector<2x8x8xf32>
    %59 = arith.addf %57, %58 : vector<2x8x8xf32>
    %cst_23 = arith.constant dense<0xFF800000> : vector<2x8xf32>
    %60 = vector.multi_reduction <maximumf>, %59, %cst_23 [2] : vector<2x8x8xf32> to vector<2x8xf32>
    %61 = vector.shape_cast %60 : vector<2x8xf32> to vector<2x8x1xf32>
    %62 = vector.broadcast %61 : vector<2x8x1xf32> to vector<2x8x8xf32>
    %63 = arith.subf %59, %62 : vector<2x8x8xf32>
    %64 = math.exp %63 : vector<2x8x8xf32>
    %cst_24 = arith.constant dense<0.000000e+00> : vector<2x8xf32>
    %65 = vector.multi_reduction <add>, %64, %cst_24 [2] : vector<2x8x8xf32> to vector<2x8xf32>
    %66 = vector.shape_cast %65 : vector<2x8xf32> to vector<2x8x1xf32>
    %67 = tpu.reciprocal %66 {approx = true} : vector<2x8x1xf32> -> vector<2x8x1xf32>
    %68 = vector.broadcast %67 : vector<2x8x1xf32> to vector<2x8x8xf32>
    %69 = arith.mulf %64, %68 : vector<2x8x8xf32>
    %70 = arith.truncf %69 : vector<2x8x8xf32> to vector<2x8x8xbf16>
    "tpu.trace_start"() <{level = 10 : i32, message = "bqk,bkd->bqd"}> : () -> ()
    %cst_25 = arith.constant dense<0.000000e+00> : vector<2x8x8xf32>
    %71 = tpu.matmul %70, %54, %cst_25 {dimension_numbers = #tpu.dot_dimension_numbers<[2], [1], [1], [2], [0, 0, 0, 1, 1, 2], [0], [0]>} : vector<2x8x8xbf16>, vector<2x8x8xbf16>, vector<2x8x8xf32> -> vector<2x8x8xf32>
    "tpu.trace_stop"() : () -> ()
    %c0_26 = arith.constant 0 : index
    %c0_27 = arith.constant 0 : index
    %c8 = arith.constant 8 : index
    %72 = vector.load %arg18[%c0_26, %c0_27, %c8] : memref<2x8x32xf32, #tpu.memory_space<vmem>>, vector<2x8x8xf32>
    tpu.vector_store %arg18[%c0_26, %c0_27, %c8], %71 {strides = array<i32>} : memref<2x8x32xf32, #tpu.memory_space<vmem>>, vector<2x8x8xf32>,
    %73 = vector.extract_strided_slice %20 {offsets = [0, 0, 16], sizes = [2, 8, 8], strides = [1, 1, 1]} : vector<2x8x32xf32> to vector<2x8x8xf32>
    %74 = arith.truncf %73 : vector<2x8x8xf32> to vector<2x8x8xbf16>
    %75 = vector.extract_strided_slice %22 {offsets = [0, 0, 16], sizes = [2, 8, 8], strides = [1, 1, 1]} : vector<2x8x32xf32> to vector<2x8x8xf32>
    %76 = arith.truncf %75 : vector<2x8x8xf32> to vector<2x8x8xbf16>
    %77 = vector.extract_strided_slice %24 {offsets = [0, 0, 16], sizes = [2, 8, 8], strides = [1, 1, 1]} : vector<2x8x32xf32> to vector<2x8x8xf32>
    %78 = arith.truncf %77 : vector<2x8x8xf32> to vector<2x8x8xbf16>
    "tpu.trace_start"() <{level = 10 : i32, message = "bqd,bkd->bqk"}> : () -> ()
    %cst_28 = arith.constant dense<0.000000e+00> : vector<2x8x8xf32>
    %79 = tpu.matmul %74, %76, %cst_28 {dimension_numbers = #tpu.dot_dimension_numbers<[2], [2], [1], [1], [0, 0, 0, 1, 1, 1], [0], [0]>} : vector<2x8x8xbf16>, vector<2x8x8xbf16>, vector<2x8x8xf32> -> vector<2x8x8xf32>
    "tpu.trace_stop"() : () -> ()
    %cst_29 = arith.constant 0.353553385 : f32
    %80 = vector.broadcast %cst_29 : f32 to vector<2x8x8xf32>
    %81 = arith.mulf %79, %80 : vector<2x8x8xf32>
    %82 = vector.broadcast %9 : vector<2x1x8xf32> to vector<2x8x8xf32>
    %83 = arith.addf %81, %82 : vector<2x8x8xf32>
    %cst_30 = arith.constant dense<0xFF800000> : vector<2x8xf32>
    %84 = vector.multi_reduction <maximumf>, %83, %cst_30 [2] : vector<2x8x8xf32> to vector<2x8xf32>
    %85 = vector.shape_cast %84 : vector<2x8xf32> to vector<2x8x1xf32>
    %86 = vector.broadcast %85 : vector<2x8x1xf32> to vector<2x8x8xf32>
    %87 = arith.subf %83, %86 : vector<2x8x8xf32>
    %88 = math.exp %87 : vector<2x8x8xf32>
    %cst_31 = arith.constant dense<0.000000e+00> : vector<2x8xf32>
    %89 = vector.multi_reduction <add>, %88, %cst_31 [2] : vector<2x8x8xf32> to vector<2x8xf32>
    %90 = vector.shape_cast %89 : vector<2x8xf32> to vector<2x8x1xf32>
    %91 = tpu.reciprocal %90 {approx = true} : vector<2x8x1xf32> -> vector<2x8x1xf32>
    %92 = vector.broadcast %91 : vector<2x8x1xf32> to vector<2x8x8xf32>
    %93 = arith.mulf %88, %92 : vector<2x8x8xf32>
    %94 = arith.truncf %93 : vector<2x8x8xf32> to vector<2x8x8xbf16>
    "tpu.trace_start"() <{level = 10 : i32, message = "bqk,bkd->bqd"}> : () -> ()
    %cst_32 = arith.constant dense<0.000000e+00> : vector<2x8x8xf32>
    %95 = tpu.matmul %94, %78, %cst_32 {dimension_numbers = #tpu.dot_dimension_numbers<[2], [1], [1], [2], [0, 0, 0, 1, 1, 2], [0], [0]>} : vector<2x8x8xbf16>, vector<2x8x8xbf16>, vector<2x8x8xf32> -> vector<2x8x8xf32>
    "tpu.trace_stop"() : () -> ()
    %c0_33 = arith.constant 0 : index
    %c0_34 = arith.constant 0 : index
    %c16 = arith.constant 16 : index
    %96 = vector.load %arg18[%c0_33, %c0_34, %c16] : memref<2x8x32xf32, #tpu.memory_space<vmem>>, vector<2x8x8xf32>
    tpu.vector_store %arg18[%c0_33, %c0_34, %c16], %95 {strides = array<i32>} : memref<2x8x32xf32, #tpu.memory_space<vmem>>, vector<2x8x8xf32>,
    %97 = vector.extract_strided_slice %20 {offsets = [0, 0, 24], sizes = [2, 8, 8], strides = [1, 1, 1]} : vector<2x8x32xf32> to vector<2x8x8xf32>
    %98 = arith.truncf %97 : vector<2x8x8xf32> to vector<2x8x8xbf16>
    %99 = vector.extract_strided_slice %22 {offsets = [0, 0, 24], sizes = [2, 8, 8], strides = [1, 1, 1]} : vector<2x8x32xf32> to vector<2x8x8xf32>
    %100 = arith.truncf %99 : vector<2x8x8xf32> to vector<2x8x8xbf16>
    %101 = vector.extract_strided_slice %24 {offsets = [0, 0, 24], sizes = [2, 8, 8], strides = [1, 1, 1]} : vector<2x8x32xf32> to vector<2x8x8xf32>
    %102 = arith.truncf %101 : vector<2x8x8xf32> to vector<2x8x8xbf16>
    "tpu.trace_start"() <{level = 10 : i32, message = "bqd,bkd->bqk"}> : () -> ()
    %cst_35 = arith.constant dense<0.000000e+00> : vector<2x8x8xf32>
    %103 = tpu.matmul %98, %100, %cst_35 {dimension_numbers = #tpu.dot_dimension_numbers<[2], [2], [1], [1], [0, 0, 0, 1, 1, 1], [0], [0]>} : vector<2x8x8xbf16>, vector<2x8x8xbf16>, vector<2x8x8xf32> -> vector<2x8x8xf32>
    "tpu.trace_stop"() : () -> ()
    %cst_36 = arith.constant 0.353553385 : f32
    %104 = vector.broadcast %cst_36 : f32 to vector<2x8x8xf32>
    %105 = arith.mulf %103, %104 : vector<2x8x8xf32>
    %106 = vector.broadcast %9 : vector<2x1x8xf32> to vector<2x8x8xf32>
    %107 = arith.addf %105, %106 : vector<2x8x8xf32>
    %cst_37 = arith.constant dense<0xFF800000> : vector<2x8xf32>
    %108 = vector.multi_reduction <maximumf>, %107, %cst_37 [2] : vector<2x8x8xf32> to vector<2x8xf32>
    %109 = vector.shape_cast %108 : vector<2x8xf32> to vector<2x8x1xf32>
    %110 = vector.broadcast %109 : vector<2x8x1xf32> to vector<2x8x8xf32>
    %111 = arith.subf %107, %110 : vector<2x8x8xf32>
    %112 = math.exp %111 : vector<2x8x8xf32>
    %cst_38 = arith.constant dense<0.000000e+00> : vector<2x8xf32>
    %113 = vector.multi_reduction <add>, %112, %cst_38 [2] : vector<2x8x8xf32> to vector<2x8xf32>
    %114 = vector.shape_cast %113 : vector<2x8xf32> to vector<2x8x1xf32>
    %115 = tpu.reciprocal %114 {approx = true} : vector<2x8x1xf32> -> vector<2x8x1xf32>
    %116 = vector.broadcast %115 : vector<2x8x1xf32> to vector<2x8x8xf32>
    %117 = arith.mulf %112, %116 : vector<2x8x8xf32>
    %118 = arith.truncf %117 : vector<2x8x8xf32> to vector<2x8x8xbf16>
    "tpu.trace_start"() <{level = 10 : i32, message = "bqk,bkd->bqd"}> : () -> ()
    %cst_39 = arith.constant dense<0.000000e+00> : vector<2x8x8xf32>
    %119 = tpu.matmul %118, %102, %cst_39 {dimension_numbers = #tpu.dot_dimension_numbers<[2], [1], [1], [2], [0, 0, 0, 1, 1, 2], [0], [0]>} : vector<2x8x8xbf16>, vector<2x8x8xbf16>, vector<2x8x8xf32> -> vector<2x8x8xf32>
    "tpu.trace_stop"() : () -> ()
    %c0_40 = arith.constant 0 : index
    %c0_41 = arith.constant 0 : index
    %c24 = arith.constant 24 : index
    %120 = vector.load %arg18[%c0_40, %c0_41, %c24] : memref<2x8x32xf32, #tpu.memory_space<vmem>>, vector<2x8x8xf32>
    tpu.vector_store %arg18[%c0_40, %c0_41, %c24], %119 {strides = array<i32>} : memref<2x8x32xf32, #tpu.memory_space<vmem>>, vector<2x8x8xf32>,
    %c0_42 = arith.constant 0 : index
    %c0_43 = arith.constant 0 : index
    %c0_44 = arith.constant 0 : index
    %121 = vector.load %arg18[%c0_42, %c0_43, %c0_44] : memref<2x8x32xf32, #tpu.memory_space<vmem>>, vector<2x8x32xf32>
    %122 = vector.shape_cast %121 : vector<2x8x32xf32> to vector<16x32xf32>
    %123 = arith.truncf %122 : vector<16x32xf32> to vector<16x32xbf16>
    %c0_45 = arith.constant 0 : index
    %c0_46 = arith.constant 0 : index
    %c0_47 = arith.constant 0 : index
    %124 = vector.load %arg6[%c0_45, %c0_46, %c0_47] : memref<1x32x32xbf16, #tpu.memory_space<vmem>>, vector<1x32x32xbf16>
    %125 = vector.shape_cast %124 : vector<1x32x32xbf16> to vector<32x32xbf16>
    %cst_48 = arith.constant dense<0.000000e+00> : vector<16x32xf32>
    %126 = tpu.matmul %123, %125, %cst_48 {dimension_numbers = #tpu.dot_dimension_numbers<[1], [0], [0], [1], [0, 0, 1, 1], [], []>} : vector<16x32xbf16>, vector<32x32xbf16>, vector<16x32xf32> -> vector<16x32xf32>
    %c0_49 = arith.constant 0 : index
    %c0_50 = arith.constant 0 : index
    %c0_51 = arith.constant 0 : index
    %127 = vector.load %arg7[%c0_49, %c0_50, %c0_51] : memref<1x1x32xf32, #tpu.memory_space<vmem>>, vector<1x1x32xf32>
    %128 = vector.shape_cast %127 : vector<1x1x32xf32> to vector<1x32xf32>
    %129 = vector.broadcast %128 : vector<1x32xf32> to vector<16x32xf32>
    %130 = arith.addf %126, %129 : vector<16x32xf32>
    %131 = arith.addf %10, %130 : vector<16x32xf32>
    %c0_52 = arith.constant 0 : index
    %c0_53 = arith.constant 0 : index
    %c0_54 = arith.constant 0 : index
    %132 = vector.load %arg8[%c0_52, %c0_53, %c0_54] : memref<1x1x32xf32, #tpu.memory_space<vmem>>, vector<1x1x32xf32>
    %133 = vector.shape_cast %132 : vector<1x1x32xf32> to vector<1x32xf32>
    %c0_55 = arith.constant 0 : index
    %c0_56 = arith.constant 0 : index
    %c0_57 = arith.constant 0 : index
    %134 = vector.load %arg9[%c0_55, %c0_56, %c0_57] : memref<1x1x32xf32, #tpu.memory_space<vmem>>, vector<1x1x32xf32>
    %135 = vector.shape_cast %134 : vector<1x1x32xf32> to vector<1x32xf32>
    %cst_58 = arith.constant dense<0.000000e+00> : vector<16xf32>
    %136 = vector.multi_reduction <add>, %131, %cst_58 [1] : vector<16x32xf32> to vector<16xf32>
    %137 = vector.shape_cast %136 : vector<16xf32> to vector<16x1xf32>
    %cst_59 = arith.constant 3.200000e+01 : f32
    %138 = vector.broadcast %cst_59 : f32 to vector<16x1xf32>
    %139 = arith.divf %137, %138 : vector<16x1xf32>
    %140 = vector.broadcast %139 : vector<16x1xf32> to vector<16x32xf32>
    %141 = arith.subf %131, %140 : vector<16x32xf32>
    %142 = arith.mulf %141, %141 : vector<16x32xf32>
    %cst_60 = arith.constant dense<0.000000e+00> : vector<16xf32>
    %143 = vector.multi_reduction <add>, %142, %cst_60 [1] : vector<16x32xf32> to vector<16xf32>
    %144 = vector.shape_cast %143 : vector<16xf32> to vector<16x1xf32>
    %cst_61 = arith.constant 3.200000e+01 : f32
    %145 = vector.broadcast %cst_61 : f32 to vector<16x1xf32>
    %146 = arith.divf %144, %145 : vector<16x1xf32>
    %147 = vector.broadcast %139 : vector<16x1xf32> to vector<16x32xf32>
    %148 = arith.subf %131, %147 : vector<16x32xf32>
    %cst_62 = arith.constant 9.99999996E-13 : f32
    %149 = vector.broadcast %cst_62 : f32 to vector<16x1xf32>
    %150 = arith.addf %146, %149 : vector<16x1xf32>
    %151 = math.rsqrt %150 : vector<16x1xf32>
    %152 = vector.broadcast %151 : vector<16x1xf32> to vector<16x32xf32>
    %153 = arith.mulf %148, %152 : vector<16x32xf32>
    %154 = vector.broadcast %133 : vector<1x32xf32> to vector<16x32xf32>
    %155 = arith.mulf %153, %154 : vector<16x32xf32>
    %156 = vector.broadcast %135 : vector<1x32xf32> to vector<16x32xf32>
    %157 = arith.addf %155, %156 : vector<16x32xf32>
    %158 = arith.truncf %157 : vector<16x32xf32> to vector<16x32xbf16>
    %c0_63 = arith.constant 0 : index
    %c0_64 = arith.constant 0 : index
    %c0_65 = arith.constant 0 : index
    %159 = vector.load %arg10[%c0_63, %c0_64, %c0_65] : memref<1x32x64xbf16, #tpu.memory_space<vmem>>, vector<1x32x64xbf16>
    %160 = vector.shape_cast %159 : vector<1x32x64xbf16> to vector<32x64xbf16>
    %cst_66 = arith.constant dense<0.000000e+00> : vector<16x64xf32>
    %161 = tpu.matmul %158, %160, %cst_66 {dimension_numbers = #tpu.dot_dimension_numbers<[1], [0], [0], [1], [0, 0, 1, 1], [], []>} : vector<16x32xbf16>, vector<32x64xbf16>, vector<16x64xf32> -> vector<16x64xf32>
    %c0_67 = arith.constant 0 : index
    %c0_68 = arith.constant 0 : index
    %c0_69 = arith.constant 0 : index
    %162 = vector.load %arg11[%c0_67, %c0_68, %c0_69] : memref<1x1x64xf32, #tpu.memory_space<vmem>>, vector<1x1x64xf32>
    %163 = vector.shape_cast %162 : vector<1x1x64xf32> to vector<1x64xf32>
    %164 = vector.broadcast %163 : vector<1x64xf32> to vector<16x64xf32>
    %165 = arith.addf %161, %164 : vector<16x64xf32>
    %cst_70 = arith.constant 5.000000e-01 : f32
    %166 = vector.broadcast %cst_70 : f32 to vector<16x64xf32>
    %167 = arith.mulf %166, %165 : vector<16x64xf32>
    %cst_71 = arith.constant 4.471500e-02 : f32
    %168 = vector.broadcast %cst_71 : f32 to vector<16x64xf32>
    %169 = arith.mulf %168, %165 : vector<16x64xf32>
    %170 = arith.mulf %169, %165 : vector<16x64xf32>
    %171 = arith.mulf %170, %165 : vector<16x64xf32>
    %172 = arith.addf %165, %171 : vector<16x64xf32>
    %cst_72 = arith.constant 0.797884583 : f32
    %173 = vector.broadcast %cst_72 : f32 to vector<16x64xf32>
    %174 = arith.mulf %173, %172 : vector<16x64xf32>
    %175 = math.tanh %174 : vector<16x64xf32>
    %cst_73 = arith.constant 1.000000e+00 : f32
    %176 = vector.broadcast %cst_73 : f32 to vector<16x64xf32>
    %177 = arith.addf %176, %175 : vector<16x64xf32>
    %178 = arith.mulf %167, %177 : vector<16x64xf32>
    %179 = arith.truncf %178 : vector<16x64xf32> to vector<16x64xbf16>
    %c0_74 = arith.constant 0 : index
    %c0_75 = arith.constant 0 : index
    %c0_76 = arith.constant 0 : index
    %180 = vector.load %arg12[%c0_74, %c0_75, %c0_76] : memref<1x64x32xbf16, #tpu.memory_space<vmem>>, vector<1x64x32xbf16>
    %181 = vector.shape_cast %180 : vector<1x64x32xbf16> to vector<64x32xbf16>
    %cst_77 = arith.constant dense<0.000000e+00> : vector<16x32xf32>
    %182 = tpu.matmul %179, %181, %cst_77 {dimension_numbers = #tpu.dot_dimension_numbers<[1], [0], [0], [1], [0, 0, 1, 1], [], []>} : vector<16x64xbf16>, vector<64x32xbf16>, vector<16x32xf32> -> vector<16x32xf32>
    %c0_78 = arith.constant 0 : index
    %c0_79 = arith.constant 0 : index
    %c0_80 = arith.constant 0 : index
    %183 = vector.load %arg13[%c0_78, %c0_79, %c0_80] : memref<1x1x32xf32, #tpu.memory_space<vmem>>, vector<1x1x32xf32>
    %184 = vector.shape_cast %183 : vector<1x1x32xf32> to vector<1x32xf32>
    %185 = vector.broadcast %184 : vector<1x32xf32> to vector<16x32xf32>
    %186 = arith.addf %182, %185 : vector<16x32xf32>
    %187 = arith.addf %157, %186 : vector<16x32xf32>
    %c0_81 = arith.constant 0 : index
    %c0_82 = arith.constant 0 : index
    %c0_83 = arith.constant 0 : index
    %188 = vector.load %arg14[%c0_81, %c0_82, %c0_83] : memref<1x1x32xf32, #tpu.memory_space<vmem>>, vector<1x1x32xf32>
    %189 = vector.shape_cast %188 : vector<1x1x32xf32> to vector<1x32xf32>
    %c0_84 = arith.constant 0 : index
    %c0_85 = arith.constant 0 : index
    %c0_86 = arith.constant 0 : index
    %190 = vector.load %arg15[%c0_84, %c0_85, %c0_86] : memref<1x1x32xf32, #tpu.memory_space<vmem>>, vector<1x1x32xf32>
    %191 = vector.shape_cast %190 : vector<1x1x32xf32> to vector<1x32xf32>
    %cst_87 = arith.constant dense<0.000000e+00> : vector<16xf32>
    %192 = vector.multi_reduction <add>, %187, %cst_87 [1] : vector<16x32xf32> to vector<16xf32>
    %193 = vector.shape_cast %192 : vector<16xf32> to vector<16x1xf32>
    %cst_88 = arith.constant 3.200000e+01 : f32
    %194 = vector.broadcast %cst_88 : f32 to vector<16x1xf32>
    %195 = arith.divf %193, %194 : vector<16x1xf32>
    %196 = vector.broadcast %195 : vector<16x1xf32> to vector<16x32xf32>
    %197 = arith.subf %187, %196 : vector<16x32xf32>
    %198 = arith.mulf %197, %197 : vector<16x32xf32>
    %cst_89 = arith.constant dense<0.000000e+00> : vector<16xf32>
    %199 = vector.multi_reduction <add>, %198, %cst_89 [1] : vector<16x32xf32> to vector<16xf32>
    %200 = vector.shape_cast %199 : vector<16xf32> to vector<16x1xf32>
    %cst_90 = arith.constant 3.200000e+01 : f32
    %201 = vector.broadcast %cst_90 : f32 to vector<16x1xf32>
    %202 = arith.divf %200, %201 : vector<16x1xf32>
    %203 = vector.broadcast %195 : vector<16x1xf32> to vector<16x32xf32>
    %204 = arith.subf %187, %203 : vector<16x32xf32>
    %cst_91 = arith.constant 9.99999996E-13 : f32
    %205 = vector.broadcast %cst_91 : f32 to vector<16x1xf32>
    %206 = arith.addf %202, %205 : vector<16x1xf32>
    %207 = math.rsqrt %206 : vector<16x1xf32>
    %208 = vector.broadcast %207 : vector<16x1xf32> to vector<16x32xf32>
    %209 = arith.mulf %204, %208 : vector<16x32xf32>
    %210 = vector.broadcast %189 : vector<1x32xf32> to vector<16x32xf32>
    %211 = arith.mulf %209, %210 : vector<16x32xf32>
    %212 = vector.broadcast %191 : vector<1x32xf32> to vector<16x32xf32>
    %213 = arith.addf %211, %212 : vector<16x32xf32>
    %214 = vector.shape_cast %213 : vector<16x32xf32> to vector<2x8x32xf32>
    %c0_92 = arith.constant 0 : index
    %c0_93 = arith.constant 0 : index
    %c0_94 = arith.constant 0 : index
    %215 = vector.load %arg17[%c0_92, %c0_93, %c0_94] : memref<2x8x32xf32, #tpu.memory_space<vmem>>, vector<2x8x32xf32>
    tpu.vector_store %arg17[%c0_92, %c0_93, %c0_94], %214 {strides = array<i32>} : memref<2x8x32xf32, #tpu.memory_space<vmem>>, vector<2x8x32xf32>,
    %c1_i32 = arith.constant 1 : i32
    %216 = arith.cmpi eq, %arg1, %c1_i32 : i32
    %217 = arith.extui %216 : i1 to i32
    %c0_i32_95 = arith.constant 0 : i32
    %218 = arith.cmpi ne, %217, %c0_i32_95 : i32
    scf.if %218 {
      %c0_96 = arith.constant 0 : index
      %c0_97 = arith.constant 0 : index
      %c0_98 = arith.constant 0 : index
      %219 = vector.load %arg16[%c0_96, %c0_97, %c0_98] : memref<2x8x32xf32, #tpu.memory_space<vmem>>, vector<2x8x32xf32>
      tpu.vector_store %arg16[%c0_96, %c0_97, %c0_98], %214 {strides = array<i32>} : memref<2x8x32xf32, #tpu.memory_space<vmem>>, vector<2x8x32xf32>,
    } else {
    }
    return
  }
  func.func @transform_0(%arg0: i32, %arg1: i32) -> (i32, i32, i32) {
    %c0_i32 = arith.constant 0 : i32
    %c0_i32_0 = arith.constant 0 : i32
    %c0_i32_1 = arith.constant 0 : i32
    return %arg0, %c0_i32, %c0_i32_0 : i32, i32, i32
  }
  func.func @transform_1(%arg0: i32, %arg1: i32) -> (i32, i32) {
    %c0_i32 = arith.constant 0 : i32
    %c0_i32_0 = arith.constant 0 : i32
    return %arg0, %c0_i32 : i32, i32
  }
  func.func @transform_2(%arg0: i32, %arg1: i32) -> (i32, i32, i32) {
    %c0_i32 = arith.constant 0 : i32
    %c0_i32_0 = arith.constant 0 : i32
    %c0_i32_1 = arith.constant 0 : i32
    return %arg1, %c0_i32, %c0_i32_0 : i32, i32, i32
  }
  func.func @transform_3(%arg0: i32, %arg1: i32) -> (i32, i32, i32) {
    %c0_i32 = arith.constant 0 : i32
    %c0_i32_0 = arith.constant 0 : i32
    %c0_i32_1 = arith.constant 0 : i32
    return %arg1, %c0_i32, %c0_i32_0 : i32, i32, i32
  }
  func.func @transform_4(%arg0: i32, %arg1: i32) -> (i32, i32, i32) {
    %c0_i32 = arith.constant 0 : i32
    %c0_i32_0 = arith.constant 0 : i32
    %c0_i32_1 = arith.constant 0 : i32
    return %arg1, %c0_i32, %c0_i32_0 : i32, i32, i32
  }
  func.func @transform_5(%arg0: i32, %arg1: i32) -> (i32, i32, i32) {
    %c0_i32 = arith.constant 0 : i32
    %c0_i32_0 = arith.constant 0 : i32
    %c0_i32_1 = arith.constant 0 : i32
    return %arg1, %c0_i32, %c0_i32_0 : i32, i32, i32
  }
  func.func @transform_6(%arg0: i32, %arg1: i32) -> (i32, i32, i32) {
    %c0_i32 = arith.constant 0 : i32
    %c0_i32_0 = arith.constant 0 : i32
    %c0_i32_1 = arith.constant 0 : i32
    return %arg1, %c0_i32, %c0_i32_0 : i32, i32, i32
  }
  func.func @transform_7(%arg0: i32, %arg1: i32) -> (i32, i32, i32) {
    %c0_i32 = arith.constant 0 : i32
    %c0_i32_0 = arith.constant 0 : i32
    %c0_i32_1 = arith.constant 0 : i32
    return %arg1, %c0_i32, %c0_i32_0 : i32, i32, i32
  }
  func.func @transform_8(%arg0: i32, %arg1: i32) -> (i32, i32, i32) {
    %c0_i32 = arith.constant 0 : i32
    %c0_i32_0 = arith.constant 0 : i32
    %c0_i32_1 = arith.constant 0 : i32
    return %arg1, %c0_i32, %c0_i32_0 : i32, i32, i32
  }
  func.func @transform_9(%arg0: i32, %arg1: i32) -> (i32, i32, i32) {
    %c0_i32 = arith.constant 0 : i32
    %c0_i32_0 = arith.constant 0 : i32
    %c0_i32_1 = arith.constant 0 : i32
    return %arg1, %c0_i32, %c0_i32_0 : i32, i32, i32
  }
  func.func @transform_10(%arg0: i32, %arg1: i32) -> (i32, i32, i32) {
    %c0_i32 = arith.constant 0 : i32
    %c0_i32_0 = arith.constant 0 : i32
    %c0_i32_1 = arith.constant 0 : i32
    return %arg1, %c0_i32, %c0_i32_0 : i32, i32, i32
  }
  func.func @transform_11(%arg0: i32, %arg1: i32) -> (i32, i32, i32) {
    %c0_i32 = arith.constant 0 : i32
    %c0_i32_0 = arith.constant 0 : i32
    %c0_i32_1 = arith.constant 0 : i32
    return %arg1, %c0_i32, %c0_i32_0 : i32, i32, i32
  }
  func.func @transform_12(%arg0: i32, %arg1: i32) -> (i32, i32, i32) {
    %c0_i32 = arith.constant 0 : i32
    %c0_i32_0 = arith.constant 0 : i32
    %c0_i32_1 = arith.constant 0 : i32
    return %arg1, %c0_i32, %c0_i32_0 : i32, i32, i32
  }
  func.func @transform_13(%arg0: i32, %arg1: i32) -> (i32, i32, i32) {
    %c0_i32 = arith.constant 0 : i32
    %c0_i32_0 = arith.constant 0 : i32
    %c0_i32_1 = arith.constant 0 : i32
    return %arg1, %c0_i32, %c0_i32_0 : i32, i32, i32
  }
  func.func @transform_14(%arg0: i32, %arg1: i32) -> (i32, i32, i32) {
    %c0_i32 = arith.constant 0 : i32
    %c0_i32_0 = arith.constant 0 : i32
    %c0_i32_1 = arith.constant 0 : i32
    return %arg0, %c0_i32, %c0_i32_0 : i32, i32, i32
  }
}

</mosaic_0001>

<bundles_post_ra>
// kernel: tpu_custom_call.1
= control target key start
LH: loop header
LB: loop body
LE: loop exit
PB: predicated region body
PF: predicated region fallthrough
CT: control target
= control target key end

     0   :  { %s4457_s0 = inlined_call_operand.hbm [shape: f32[2,8,32], index: 0, kind: input, shape index: {}]   ;;  %s4458_s1 = inlined_call_operand.hbm [shape: f32[2,8], index: 1, kind: input, shape index: {}]   ;;  %s4459_s2 = inlined_call_operand.hbm [shape: bf16[2,32,96], index: 2, kind: input, shape index: {}]   ;;  %s4460_s3 = inlined_call_operand.hbm [shape: f32[2,1,96], index: 3, kind: input, shape index: {}]   ;;  %s4461_s4 = inlined_call_operand.hbm [shape: bf16[2,32,32], index: 4, kind: input, shape index: {}]   ;;  %s4462_s5 = inlined_call_operand.hbm [shape: f32[2,1,32], index: 5, kind: input, shape index: {}]   ;;  %s4463_s6 = inlined_call_operand.hbm [shape: f32[2,1,32], index: 6, kind: input, shape index: {}]   ;;  %s4464_s7 = inlined_call_operand.hbm [shape: f32[2,1,32], index: 7, kind: input, shape index: {}]   ;;  %s4465_s8 = inlined_call_operand.hbm [shape: bf16[2,32,64], index: 8, kind: input, shape index: {}]   ;;  %s4466_s9 = inlined_call_operand.hbm [shape: f32[2,1,64], index: 9, kind: input, shape index: {}]   ;;  %s4467_s10 = inlined_call_operand.hbm [shape: bf16[2,64,32], index: 10, kind: input, shape index: {}]   ;;  %s4468_s11 = inlined_call_operand.hbm [shape: f32[2,1,32], index: 11, kind: input, shape index: {}]   ;;  %s4469_s12 = inlined_call_operand.hbm [shape: f32[2,1,32], index: 12, kind: input, shape index: {}]   ;;  %s4470_s13 = inlined_call_operand.hbm [shape: f32[2,1,32], index: 13, kind: input, shape index: {}]   ;;  %s4471_s14 = inlined_call_operand.hbm [shape: f32[2,8,32], index: 14, kind: output, shape index: {}]  }
   0x1   :  { %4506 = sst [smem:[#allocation36_spill]] %s4457_s0 }
   0x2   :  { %4507 = sst [smem:[#allocation37_spill]] %s4458_s1 }
   0x3   :  { %4508 = sst [smem:[#allocation38_spill]] %s4459_s2 }
   0x4   :  { %4509 = sst [smem:[#allocation39_spill]] %s4460_s3 }
   0x5   :  { %4510 = sst [smem:[#allocation40_spill]] %s4461_s4 }
   0x6   :  { %4511 = sst [smem:[#allocation41_spill]] %s4469_s12 }
   0x7   :  { %4512 = sst [smem:[#allocation42_spill]] %s4470_s13 }
   0x8   :  { %4513 = sst [smem:[#allocation43_spill]] %s4471_s14 }
   0x9   :  { %19 = vsyncpa [#allocation5], 0 }
   0xa   :  { %20 = vsyncpa [#allocation8], 0 }
   0xb   :  { %21 = vsyncpa [#allocation6], 0  ;;  %s3666_s29 = smov 0   ;;  %s3668_s30 = smov 0  }
   0xc   :  { %s3670_s15 = smov 0   ;;  %s3672_s16 = smov 0  }
   0xd   :  { %s3674_s17 = smov 0   ;;  %s3676_s18 = smov 0  }
   0xe LB: > { %4514 = sst [smem:[#allocation26_spill]] %s3536_s30  ;;  %s3695_s19 = sadd.s32 4294967295, %s3552_s18   ;;  %s3552_s18 = sphi %s3676_s18, %s27_s18   ;;  %s3548_s17 = sphi %s3674_s17, %s4575_s17   ;;  %s3544_s16 = sphi %s3672_s16, %s4574_s16   ;;  %s3540_s15 = sphi %s3670_s15, %s4572_s15   ;;  %s3536_s30 = sphi %s3668_s30, %s4571_s30   ;;  %s3532_s29 = sphi %s3666_s29, %s4570_s29  }
   0xf   : > { %4515 = sst [smem:[#allocation27_spill]] %s3540_s15  ;;  %p105_p0 = scmp.ne.s32.totalorder %s3540_s15, %s3536_s30 }
  0x10   : > { %4516 = sst [smem:[#allocation28_spill]] %s3544_s16  ;;  %p106_p1 = scmp.eq.s32.totalorder %s3552_s18, 0 }
  0x11   : > { %4517 = sst [smem:[#allocation29_spill]] %s3552_s18  ;;  %p111_p2 = scmp.ne.s32.totalorder %s3536_s30, %s3532_s29 }
  0x12   : > { %4518 = sst [smem:[#allocation30_spill]] %s3695_s19  ;;  %p4475_p3 = scmp.eq.s32.totalorder %s3695_s19, 0 }
  0x13   : > { %p3703_p4 = por %p106_p1, %p105_p0  ;;  %p2577_p5 = scmp.ge.s32.totalorder %s3552_s18, 1 }
  0x14   : > { %p3710_p6 = por %p4475_p3, %p111_p2  ;;  %p434_p7 = scmp.lt.s32.totalorder %s3552_s18, 3 }
  0x15   : > { %s3554_s24 = smov [#allocation4]   ;;  %p2916_p10 = scmp.lt.s32.totalorder %s3552_s18, 2 }
  0x16   : > { %s4520_s22 = scalar_select %p3710_p6, 1, 0 }
  0x17   : > { %p3715_p8 = pnand %p2577_p5, %p434_p7  ;;  %s449_s25 = sshll.u32 %s3554_s24, 4  ;;  %s3719_s25 = int_to_ptr.vmem [resolvable:$true] %s449_s25 }
  0x18   : > { %4521 = sst [smem:[#allocation31_spill]] %s4520_s22  ;;  %s3732_s28 = sand.u32 1, %s3540_s15  }
  0x19   : > { %s4522_s23 = scalar_select %p3715_p8, 1, 0 }
  0x1a   : > { %p2870_p9 = pneg %p3715_p8  ;;  %p3736_p12 = pnand %p2916_p10, %p3703_p4 }
  0x1b   : > { %4523 = sst [smem:[#allocation32_spill]] %s4522_s23 }
  0x1c   : > { %p3726_p11 = pnand %p2870_p9, %p4475_p3  ;;  %s4527_s0 = sld [smem:[#allocation36_spill]] }
  0x1d   : > { %s4526_s29 = scalar_select %p3736_p12, 1, 0 }
  0x1e   : > { %s4524_s26 = scalar_select %p3726_p11, 1, 0 }
  0x1f   : > { %p4485_p0 = pneg %p3726_p11 }
  0x20   : > { %4525 = sst [smem:[#allocation33_spill]] %s4524_s26 }
  0x22   : > { %s3048_s14 = scalar_lea.hbm %s4527_s0, 256 }
  0x23   : > { %p3049_p13 = scmp.ne.s32.totalorder %s4527_s0, %s3048_s14  ;;  %p3055_p4 = scmp.lt.u32.totalorder %s3048_s14, %s4527_s0 }
  0x25   : > { %p3051_p1 = pnand %p4485_p0, %p3049_p13 }
  0x27   : > { %p3052_p2 = pneg %p3051_p1 }
  0x29   : > { %p3057_p5 = pnand %p3055_p4, %p3052_p2 }
  0x2b   : > { %3060 = shalt.err (!%p3057_p5)
}
  0x2c   : > { %s3061_s20 = scalar_lea.vmem %s3719_s25, 256  ;;  %p3069_p3 = scmp.lt.s32.totalorder %s3719_s25, %s3719_s25 }
  0x2d   : > { %p3062_p7 = scmp.ne.s32.totalorder %s3719_s25, %s3061_s20  ;;  %p3070_p13 = scmp.lt.s32.totalorder %s3061_s20, %s3061_s20 }
  0x2f   : > { %p3064_p9 = pnand %p3062_p7, %p4485_p0  ;;  %p3071_p1 = por %p3070_p13, %p3069_p3 }
  0x31   : > { %p3065_p10 = pneg %p3064_p9 }
  0x33   : > { %p3072_p6 = pnand %p3071_p1, %p3065_p10 }
  0x35   : > { %3075 = shalt.err (!%p3072_p6)
}
  0x36   : > { %s3555_s16 = smov 128   ;;  %s3556_s14 = smov 8  }
  0x37   : > { %2873 = dma.hbm_to_vmem [thread:$0]  (!%p3726_p11), %s4527_s0, 256, %s3719_s25, [#allocation5], %s3555_s16, %s3555_s16, %s3556_s14  }
  0x38   : > { %s3768_s24 = sshll.u32 %s3732_s28, 4  ;;  %s36_s21 = sadd.s32 1, %s3548_s17 }
  0x39   : > { %p37_p3 = scmp.ge.s32.totalorder %s36_s21, 2  ;;  %s3772_s20 = sshll.u32 %s3548_s17, 8 }
  0x3a   : > { %s4528_s2 = sld [smem:[#allocation38_spill]]  ;;  %s480_s13 = scalar_lea.vmem [#allocation9], %s3768_s24 }
  0x3b   : > { %s487_s22 = sshll.u32 %s480_s13, 4  ;;  %s4577_s21 = smov (%p37_p3, %s36_s21), 0  ;;  %s3783_s22 = int_to_ptr.vmem [resolvable:$true] %s487_s22 }
  0x3c   : > { %4529 = sst [smem:[#allocation34_spill]] %s4577_s21  ;;  %s95_s25 = ssub.s32 %s3548_s17, %s4577_s21 }
  0x3d   : > { %p3787_p6 = scmp.eq.s32.totalorder %s95_s25, 0  ;;  %s4531_s14 = sand.u32 1, %s3552_s18  }
  0x3e   : > { %s3793_s30 = scalar_lea.sflag [#allocation5], %s4531_s14  ;;  %p3799_p4 = pneg %p3736_p12 }
  0x3f   : > { %s4530_s16 = scalar_select %p3787_p6, 1, 0 }
  0x40   : > { %s3778_s23 = scalar_lea.hbm %s4528_s2, %s3772_s20  ;;  %s3081_s25 = scalar_lea.hbm %s4528_s2, 512 }
  0x41   : > { %s3076_s19 = scalar_lea.hbm %s3778_s23, 256  ;;  %p3082_p9 = scmp.lt.u32.totalorder %s3778_s23, %s4528_s2 }
  0x42   : > { %p3077_p2 = scmp.ne.s32.totalorder %s3778_s23, %s3076_s19  ;;  %p3083_p10 = scmp.lt.u32.totalorder %s3081_s25, %s3076_s19 }
  0x43   : > { %s4532_s27 = scalar_select %p3799_p4, 1, 0 }
  0x44   : > { %p3079_p5 = pnand %p3799_p4, %p3077_p2  ;;  %p3084_p13 = por %p3083_p10, %p3082_p9 }
  0x45   : > { %p3085_p1 = scmp.lt.u32.totalorder %s3076_s19, %s3778_s23 }
  0x46   : > { %p3080_p7 = pneg %p3079_p5 }
  0x47   : > { %p3086_p3 = por %p3085_p1, %p3084_p13 }
  0x49   : > { %p3087_p0 = pnand %p3086_p3, %p3080_p7 }
  0x4b   : > { %3090 = shalt.err (!%p3087_p0)
}
  0x4c   : > { %s3091_s14 = scalar_lea.vmem %s3783_s22, 256  ;;  %s3557_s0 = smov [#allocation9]  }
  0x4d   : > { %p3092_p2 = scmp.ne.s32.totalorder %s3783_s22, %s3091_s14  ;;  %s3096_s13 = sshll.u32 %s3557_s0, 4  ;;  %s3097_s13 = int_to_ptr.vmem [resolvable:$false] %s3096_s13 }
  0x4e   : > { %s3098_s1 = scalar_lea.vmem %s3097_s13, 512  ;;  %p3099_p11 = scmp.lt.s32.totalorder %s3783_s22, %s3097_s13 }
  0x4f   : > { %p3094_p5 = pnand %p3092_p2, %p3799_p4  ;;  %p3100_p6 = scmp.lt.s32.totalorder %s3098_s1, %s3091_s14 }
  0x51   : > { %p3095_p8 = pneg %p3094_p5  ;;  %p3101_p9 = por %p3100_p6, %p3099_p11 }
  0x53   : > { %p3102_p10 = pnand %p3101_p9, %p3095_p8 }
  0x55   : > { %3105 = shalt.err (!%p3102_p10)
}
  0x56   : > { %s4493_s21 = smov 64   ;;  %s4497_s19 = smov 4  }
  0x57   : > { %2880 = dma.hbm_to_vmem [thread:$0]  (!%p3736_p12), %s3778_s23, 256, %s3783_s22, %s3793_s30, %s4493_s21, %s4493_s21, %s4497_s19  }
  0x58   : > { %s4533_s25 = sadd.s32 1, %s3540_s15  ;;  %p4534_p8 = scmp.ne.s32.totalorder %s4530_s16, 0 }
  0x59   : > { %s3834_s0 = sshll.u32 %s3548_s17, 4  ;;  %s500_s13 = scalar_lea.vmem [#allocation10], %s3732_s28 }
  0x5a   : > { %s3831_s14 = scalar_select %p4534_p8, %s3540_s15, %s4533_s25  }
  0x5b   : > { %s507_s1 = sshll.u32 %s500_s13, 4  ;;  %s4536_s3 = sld [smem:[#allocation39_spill]]  ;;  %s508_s1 = int_to_ptr.vmem [resolvable:$true] %s507_s1 }
  0x5c   : > { %4535 = sst [smem:[#allocation35_spill]] %s3831_s14 }
  0x61   : > { %s505_s26 = scalar_lea.hbm %s4536_s3, %s3834_s0  ;;  %s3111_s16 = scalar_lea.hbm %s4536_s3, 32 }
  0x62   : > { %s3106_s12 = scalar_lea.hbm %s505_s26, 16  ;;  %p3112_p7 = scmp.lt.u32.totalorder %s505_s26, %s4536_s3 }
  0x63   : > { %p3107_p11 = scmp.ne.s32.totalorder %s505_s26, %s3106_s12  ;;  %p3113_p13 = scmp.lt.u32.totalorder %s3111_s16, %s3106_s12 }
  0x64   : > { %p3115_p3 = scmp.lt.u32.totalorder %s3106_s12, %s505_s26 }
  0x65   : > { %p3109_p0 = pnand %p3107_p11, %p3799_p4  ;;  %p3114_p1 = por %p3113_p13, %p3112_p7 }
  0x67   : > { %p3110_p6 = pneg %p3109_p0  ;;  %p3116_p2 = por %p3115_p3, %p3114_p1 }
  0x69   : > { %p3117_p5 = pnand %p3116_p2, %p3110_p6 }
  0x6b   : > { %3120 = shalt.err (!%p3117_p5)
}
  0x6c   : > { %s3121_s2 = scalar_lea.vmem %s508_s1, 16  ;;  %s3560_s18 = smov [#allocation10]  }
  0x6d   : > { %p3122_p9 = scmp.ne.s32.totalorder %s508_s1, %s3121_s2  ;;  %s3126_s13 = sshll.u32 %s3560_s18, 4  ;;  %s3127_s13 = int_to_ptr.vmem [resolvable:$false] %s3126_s13 }
  0x6e   : > { %s3128_s23 = scalar_lea.vmem %s3127_s13, 32  ;;  %p3129_p11 = scmp.lt.s32.totalorder %s508_s1, %s3127_s13 }
  0x6f   : > { %p3124_p10 = pnand %p3122_p9, %p3799_p4  ;;  %p3130_p0 = scmp.lt.s32.totalorder %s3128_s23, %s3121_s2 }
  0x71   : > { %p3125_p8 = pneg %p3124_p10  ;;  %p3131_p12 = por %p3130_p0, %p3129_p11 }
  0x73   : > { %p3132_p7 = pnand %p3131_p12, %p3125_p8 }
  0x75   : > { %3135 = shalt.err (!%p3132_p7)
}
  0x76   : > { %p4537_p13 = scmp.ne.s32.totalorder %s4526_s29, 0  ;;  %s4538_s4 = sld [smem:[#allocation40_spill]] }
  0x77   : > { %s518_s16 = scalar_lea.vmem [#allocation11], %s3768_s24  ;;  %s3867_s13 = scalar_lea.hbm %s4462_s5, %s3834_s0 }
  0x78   : > { %2883 = dma.hbm_to_vmem [thread:$0]  (!%p4537_p13), %s505_s26, 16, %s508_s1, %s3793_s30  }
  0x79   : > { %s525_s25 = sshll.u32 %s518_s16, 4  ;;  %s3861_s25 = int_to_ptr.vmem [resolvable:$true] %s525_s25 }
  0x7c   : > { %s3858_s22 = scalar_lea.hbm %s4538_s4, %s3772_s20  ;;  %s3141_s12 = scalar_lea.hbm %s4538_s4, 512 }
  0x7d   : > { %s3136_s23 = scalar_lea.hbm %s3858_s22, 256  ;;  %p3142_p3 = scmp.lt.u32.totalorder %s3858_s22, %s4538_s4 }
  0x7e   : > { %p3137_p12 = scmp.ne.s32.totalorder %s3858_s22, %s3136_s23  ;;  %p3143_p2 = scmp.lt.u32.totalorder %s3141_s12, %s3136_s23 }
  0x7f   : > { %p3145_p9 = scmp.lt.u32.totalorder %s3136_s23, %s3858_s22 }
  0x80   : > { %p3139_p6 = pnand %p3137_p12, %p3799_p4  ;;  %p3144_p5 = por %p3143_p2, %p3142_p3 }
  0x82   : > { %p3140_p1 = pneg %p3139_p6  ;;  %p3146_p10 = por %p3145_p9, %p3144_p5 }
  0x84   : > { %p3147_p8 = pnand %p3146_p10, %p3140_p1 }
  0x86   : > { %3150 = shalt.err (!%p3147_p8)
}
  0x87   : > { %s3151_s16 = scalar_lea.vmem %s3861_s25, 256  ;;  %s3561_s2 = smov [#allocation11]  }
  0x88   : > { %p3152_p11 = scmp.ne.s32.totalorder %s3861_s25, %s3151_s16  ;;  %s3156_s18 = sshll.u32 %s3561_s2, 4  ;;  %s3157_s18 = int_to_ptr.vmem [resolvable:$false] %s3156_s18 }
  0x89   : > { %s3158_s19 = scalar_lea.vmem %s3157_s18, 512  ;;  %p3159_p12 = scmp.lt.s32.totalorder %s3861_s25, %s3157_s18 }
  0x8a   : > { %p3154_p0 = pnand %p3152_p11, %p3799_p4  ;;  %p3160_p6 = scmp.lt.s32.totalorder %s3158_s19, %s3151_s16 }
  0x8c   : > { %p3155_p7 = pneg %p3154_p0  ;;  %p3161_p3 = por %p3160_p6, %p3159_p12 }
  0x8e   : > { %p3162_p2 = pnand %p3161_p3, %p3155_p7 }
  0x90   : > { %3165 = shalt.err (!%p3162_p2)
}
  0x91   : > { %s4539_s23 = smov 4   ;;  %s4540_s26 = smov 64  }
  0x92   : > { %2886 = dma.hbm_to_vmem [thread:$0]  (!%p4537_p13), %s3858_s22, 256, %s3861_s25, %s3793_s30, %s4540_s26, %s4540_s26, %s4539_s23  }
  0x93   : > { %s538_s1 = scalar_lea.vmem [#allocation12], %s3732_s28  ;;  %s3899_s2 = scalar_lea.hbm %s4463_s6, %s3834_s0 }
  0x94   : > { %s545_s12 = sshll.u32 %s538_s1, 4  ;;  %s3166_s18 = scalar_lea.hbm %s3867_s13, 16  ;;  %s546_s12 = int_to_ptr.vmem [resolvable:$true] %s545_s12 }
  0x95   : > { %p3167_p1 = scmp.ne.s32.totalorder %s3867_s13, %s3166_s18  ;;  %s3171_s4 = scalar_lea.hbm %s4462_s5, 32 }
  0x96   : > { %p3172_p10 = scmp.lt.u32.totalorder %s3867_s13, %s4462_s5  ;;  %p3173_p8 = scmp.lt.u32.totalorder %s3171_s4, %s3166_s18 }
  0x97   : > { %p3169_p5 = pnand %p3167_p1, %p3799_p4  ;;  %p3175_p0 = scmp.lt.u32.totalorder %s3166_s18, %s3867_s13 }
  0x98   : > { %p3174_p11 = por %p3173_p8, %p3172_p10 }
  0x99   : > { %p3170_p9 = pneg %p3169_p5 }
  0x9a   : > { %p3176_p7 = por %p3175_p0, %p3174_p11 }
  0x9c   : > { %p3177_p12 = pnand %p3176_p7, %p3170_p9 }
  0x9e   : > { %3180 = shalt.err (!%p3177_p12)
}
  0x9f   : > { %s3181_s22 = scalar_lea.vmem %s546_s12, 16  ;;  %s3562_s25 = smov [#allocation12]  }
  0xa0   : > { %p3182_p6 = scmp.ne.s32.totalorder %s546_s12, %s3181_s22  ;;  %s3186_s1 = sshll.u32 %s3562_s25, 4  ;;  %s3187_s1 = int_to_ptr.vmem [resolvable:$false] %s3186_s1 }
  0xa1   : > { %s3188_s3 = scalar_lea.vmem %s3187_s1, 32  ;;  %p3189_p1 = scmp.lt.s32.totalorder %s546_s12, %s3187_s1 }
  0xa2   : > { %p3184_p3 = pnand %p3182_p6, %p3799_p4  ;;  %p3190_p5 = scmp.lt.s32.totalorder %s3188_s3, %s3181_s22 }
  0xa4   : > { %p3185_p2 = pneg %p3184_p3  ;;  %p3191_p13 = por %p3190_p5, %p3189_p1 }
  0xa6   : > { %p3192_p8 = pnand %p3191_p13, %p3185_p2 }
  0xa8   : > { %3195 = shalt.err (!%p3192_p8)
}
  0xa9   : > { %p4541_p10 = scmp.ne.s32.totalorder %s4526_s29, 0  ;;  %s555_s4 = scalar_lea.vmem [#allocation13], %s3732_s28 }
  0xaa   : > { %s562_s15 = sshll.u32 %s555_s4, 4  ;;  %s3924_s16 = scalar_lea.hbm %s4464_s7, %s3834_s0  ;;  %s563_s15 = int_to_ptr.vmem [resolvable:$true] %s562_s15 }
  0xab   : > { %2889 = dma.hbm_to_vmem [thread:$0]  (!%p4541_p10), %s3867_s13, 16, %s546_s12, %s3793_s30  }
  0xac   : > { %s3196_s18 = scalar_lea.hbm %s3899_s2, 16  ;;  %s3201_s25 = scalar_lea.hbm %s4463_s6, 32 }
  0xad   : > { %p3197_p13 = scmp.ne.s32.totalorder %s3899_s2, %s3196_s18  ;;  %p3202_p0 = scmp.lt.u32.totalorder %s3899_s2, %s4463_s6 }
  0xae   : > { %p3203_p7 = scmp.lt.u32.totalorder %s3201_s25, %s3196_s18  ;;  %p3205_p6 = scmp.lt.u32.totalorder %s3196_s18, %s3899_s2 }
  0xaf   : > { %p3199_p9 = pnand %p3197_p13, %p3799_p4 }
  0xb0   : > { %p3204_p12 = por %p3203_p7, %p3202_p0 }
  0xb1   : > { %p3200_p11 = pneg %p3199_p9 }
  0xb2   : > { %p3206_p3 = por %p3205_p6, %p3204_p12 }
  0xb4   : > { %p3207_p2 = pnand %p3206_p3, %p3200_p11 }
  0xb6   : > { %3210 = shalt.err (!%p3207_p2)
}
  0xb7   : > { %s3211_s13 = scalar_lea.vmem %s563_s15, 16  ;;  %s3563_s12 = smov [#allocation13]  }
  0xb8   : > { %p3212_p1 = scmp.ne.s32.totalorder %s563_s15, %s3211_s13  ;;  %s3216_s4 = sshll.u32 %s3563_s12, 4  ;;  %s3217_s4 = int_to_ptr.vmem [resolvable:$false] %s3216_s4 }
  0xb9   : > { %s3218_s14 = scalar_lea.vmem %s3217_s4, 32  ;;  %p3219_p13 = scmp.lt.s32.totalorder %s563_s15, %s3217_s4 }
  0xba   : > { %p3214_p5 = pnand %p3212_p1, %p3799_p4  ;;  %p3220_p9 = scmp.lt.s32.totalorder %s3218_s14, %s3211_s13 }
  0xbc   : > { %p3215_p8 = pneg %p3214_p5  ;;  %p3221_p10 = por %p3220_p9, %p3219_p13 }
  0xbe   : > { %p3222_p0 = pnand %p3221_p10, %p3215_p8 }
  0xc0   : > { %3225 = shalt.err (!%p3222_p0)
}
  0xc1   : > { %p4542_p7 = scmp.ne.s32.totalorder %s4526_s29, 0  ;;  %s572_s21 = scalar_lea.vmem [#allocation14], %s3732_s28 }
  0xc2   : > { %s579_s18 = sshll.u32 %s572_s21, 4  ;;  %s3949_s25 = scalar_lea.hbm %s4465_s8, %s3772_s20  ;;  %s580_s18 = int_to_ptr.vmem [resolvable:$true] %s579_s18 }
  0xc3   : > { %2892 = dma.hbm_to_vmem [thread:$0]  (!%p4542_p7), %s3899_s2, 16, %s563_s15, %s3793_s30  }
  0xc4   : > { %s3226_s1 = scalar_lea.hbm %s3924_s16, 16  ;;  %s3231_s12 = scalar_lea.hbm %s4464_s7, 32 }
  0xc5   : > { %p3227_p10 = scmp.ne.s32.totalorder %s3924_s16, %s3226_s1  ;;  %p3232_p6 = scmp.lt.u32.totalorder %s3924_s16, %s4464_s7 }
  0xc6   : > { %p3233_p3 = scmp.lt.u32.totalorder %s3231_s12, %s3226_s1  ;;  %p3235_p1 = scmp.lt.u32.totalorder %s3226_s1, %s3924_s16 }
  0xc7   : > { %p3229_p11 = pnand %p3227_p10, %p3799_p4 }
  0xc8   : > { %p3234_p2 = por %p3233_p3, %p3232_p6 }
  0xc9   : > { %p3230_p12 = pneg %p3229_p11 }
  0xca   : > { %p3236_p5 = por %p3235_p1, %p3234_p2 }
  0xcc   : > { %p3237_p8 = pnand %p3236_p5, %p3230_p12 }
  0xce   : > { %3240 = shalt.err (!%p3237_p8)
}
  0xcf   : > { %s3241_s20 = scalar_lea.vmem %s580_s18, 16  ;;  %s3564_s2 = smov [#allocation14]  }
  0xd0   : > { %p3242_p13 = scmp.ne.s32.totalorder %s580_s18, %s3241_s20  ;;  %s3246_s15 = sshll.u32 %s3564_s2, 4  ;;  %s3247_s15 = int_to_ptr.vmem [resolvable:$false] %s3246_s15 }
  0xd1   : > { %s3248_s21 = scalar_lea.vmem %s3247_s15, 32  ;;  %p3249_p10 = scmp.lt.s32.totalorder %s580_s18, %s3247_s15 }
  0xd2   : > { %p3244_p9 = pnand %p3242_p13, %p3799_p4  ;;  %p3250_p11 = scmp.lt.s32.totalorder %s3248_s21, %s3241_s20 }
  0xd4   : > { %p3245_p0 = pneg %p3244_p9  ;;  %p3251_p7 = por %p3250_p11, %p3249_p10 }
  0xd6   : > { %p3252_p3 = pnand %p3251_p7, %p3245_p0 }
  0xd8   : > { %3255 = shalt.err (!%p3252_p3)
}
  0xd9   : > { %p4543_p6 = scmp.ne.s32.totalorder %s4526_s29, 0  ;;  %s590_s19 = scalar_lea.vmem [#allocation15], %s3768_s24 }
  0xda   : > { %s597_s22 = sshll.u32 %s590_s19, 4  ;;  %s3976_s13 = scalar_lea.hbm %s4466_s9, %s3834_s0  ;;  %s3970_s22 = int_to_ptr.vmem [resolvable:$true] %s597_s22 }
  0xdb   : > { %2895 = dma.hbm_to_vmem [thread:$0]  (!%p4543_p6), %s3924_s16, 16, %s580_s18, %s3793_s30  }
  0xdc   : > { %s3256_s12 = scalar_lea.hbm %s3949_s25, 256  ;;  %s3261_s20 = scalar_lea.hbm %s4465_s8, 512 }
  0xdd   : > { %p3257_p7 = scmp.ne.s32.totalorder %s3949_s25, %s3256_s12  ;;  %p3262_p1 = scmp.lt.u32.totalorder %s3949_s25, %s4465_s8 }
  0xde   : > { %p3263_p5 = scmp.lt.u32.totalorder %s3261_s20, %s3256_s12  ;;  %p3265_p13 = scmp.lt.u32.totalorder %s3256_s12, %s3949_s25 }
  0xdf   : > { %p3259_p12 = pnand %p3257_p7, %p3799_p4 }
  0xe0   : > { %p3264_p8 = por %p3263_p5, %p3262_p1 }
  0xe1   : > { %p3260_p2 = pneg %p3259_p12 }
  0xe2   : > { %p3266_p9 = por %p3265_p13, %p3264_p8 }
  0xe4   : > { %p3267_p0 = pnand %p3266_p9, %p3260_p2 }
  0xe6   : > { %3270 = shalt.err (!%p3267_p0)
}
  0xe7   : > { %s3271_s24 = scalar_lea.vmem %s3970_s22, 256  ;;  %s3565_s18 = smov [#allocation15]  }
  0xe8   : > { %p3272_p10 = scmp.ne.s32.totalorder %s3970_s22, %s3271_s24  ;;  %s3276_s15 = sshll.u32 %s3565_s18, 4  ;;  %s3277_s15 = int_to_ptr.vmem [resolvable:$false] %s3276_s15 }
  0xe9   : > { %s3278_s21 = scalar_lea.vmem %s3277_s15, 512  ;;  %p3279_p7 = scmp.lt.s32.totalorder %s3970_s22, %s3277_s15 }
  0xea   : > { %p3274_p11 = pnand %p3272_p10, %p3799_p4  ;;  %p3280_p12 = scmp.lt.s32.totalorder %s3278_s21, %s3271_s24 }
  0xec   : > { %p3275_p3 = pneg %p3274_p11  ;;  %p3281_p1 = por %p3280_p12, %p3279_p7 }
  0xee   : > { %p3282_p5 = pnand %p3281_p1, %p3275_p3 }
  0xf0   : > { %3285 = shalt.err (!%p3282_p5)
}
  0xf1   : > { %2898 = dma.hbm_to_vmem [thread:$0]  (!%p4543_p6), %s3949_s25, 256, %s3970_s22, %s3793_s30, %s4540_s26, %s4540_s26, %s4539_s23  }
  0xf2   : > { %s610_s19 = scalar_lea.vmem [#allocation16], %s3732_s28  ;;  %s2595_s3 = sshll.u32 %s3732_s28, 5 }
  0xf3   : > { %s617_s1 = sshll.u32 %s610_s19, 4  ;;  %s3286_s12 = scalar_lea.hbm %s3976_s13, 16  ;;  %s618_s1 = int_to_ptr.vmem [resolvable:$true] %s617_s1 }
  0xf4   : > { %p3287_p2 = scmp.ne.s32.totalorder %s3976_s13, %s3286_s12  ;;  %s3291_s20 = scalar_lea.hbm %s4466_s9, 32 }
  0xf5   : > { %p3292_p9 = scmp.lt.u32.totalorder %s3976_s13, %s4466_s9  ;;  %p3293_p0 = scmp.lt.u32.totalorder %s3291_s20, %s3286_s12 }
  0xf6   : > { %p3289_p8 = pnand %p3287_p2, %p3799_p4  ;;  %p3295_p11 = scmp.lt.u32.totalorder %s3286_s12, %s3976_s13 }
  0xf7   : > { %p3294_p10 = por %p3293_p0, %p3292_p9 }
  0xf8   : > { %p3290_p13 = pneg %p3289_p8 }
  0xf9   : > { %p3296_p3 = por %p3295_p11, %p3294_p10 }
  0xfb   : > { %p3297_p7 = pnand %p3296_p3, %p3290_p13 }
  0xfd   : > { %3300 = shalt.err (!%p3297_p7)
}
  0xfe   : > { %s3301_s25 = scalar_lea.vmem %s618_s1, 16  ;;  %s3566_s22 = smov [#allocation16]  }
  0xff   : > { %p3302_p12 = scmp.ne.s32.totalorder %s618_s1, %s3301_s25  ;;  %s3306_s24 = sshll.u32 %s3566_s22, 4  ;;  %s3307_s24 = int_to_ptr.vmem [resolvable:$false] %s3306_s24 }
 0x100   : > { %s3308_s18 = scalar_lea.vmem %s3307_s24, 32  ;;  %p3309_p2 = scmp.lt.s32.totalorder %s618_s1, %s3307_s24 }
 0x101   : > { %p3304_p1 = pnand %p3302_p12, %p3799_p4  ;;  %p3310_p8 = scmp.lt.s32.totalorder %s3308_s18, %s3301_s25 }
 0x103   : > { %p3305_p5 = pneg %p3304_p1  ;;  %p3311_p6 = por %p3310_p8, %p3309_p2 }
 0x105   : > { %p3312_p0 = pnand %p3311_p6, %p3305_p5 }
 0x107   : > { %3315 = shalt.err (!%p3312_p0)
}
 0x108   : > { %p4544_p9 = scmp.ne.s32.totalorder %s4526_s29, 0  ;;  %s2655_s15 = sshll.u32 %s3548_s17, 9 }
 0x109   : > { %s628_s21 = scalar_lea.vmem [#allocation17], %s2595_s3  ;;  %s4029_s14 = scalar_lea.hbm %s4467_s10, %s2655_s15 }
 0x10a   : > { %2901 = dma.hbm_to_vmem [thread:$0]  (!%p4544_p9), %s3976_s13, 16, %s618_s1, %s3793_s30  }
 0x10b   : > { %s635_s19 = sshll.u32 %s628_s21, 4  ;;  %s3316_s20 = scalar_lea.hbm %s4029_s14, 512  ;;  %s4031_s19 = int_to_ptr.vmem [resolvable:$true] %s635_s19 }
 0x10c   : > { %p3317_p6 = scmp.ne.s32.totalorder %s4029_s14, %s3316_s20  ;;  %s3321_s3 = scalar_lea.hbm %s4467_s10, 1024 }
 0x10d   : > { %p3322_p11 = scmp.lt.u32.totalorder %s4029_s14, %s4467_s10  ;;  %p3323_p3 = scmp.lt.u32.totalorder %s3321_s3, %s3316_s20 }
 0x10e   : > { %p3319_p13 = pnand %p3317_p6, %p3799_p4  ;;  %p3325_p12 = scmp.lt.u32.totalorder %s3316_s20, %s4029_s14 }
 0x10f   : > { %p3324_p7 = por %p3323_p3, %p3322_p11 }
 0x110   : > { %p3320_p10 = pneg %p3319_p13 }
 0x111   : > { %p3326_p1 = por %p3325_p12, %p3324_p7 }
 0x113   : > { %p3327_p5 = pnand %p3326_p1, %p3320_p10 }
 0x115   : > { %3330 = shalt.err (!%p3327_p5)
}
 0x116   : > { %s3331_s25 = scalar_lea.vmem %s4031_s19, 512  ;;  %s3567_s22 = smov [#allocation17]  }
 0x117   : > { %p3332_p2 = scmp.ne.s32.totalorder %s4031_s19, %s3331_s25  ;;  %s3336_s24 = sshll.u32 %s3567_s22, 4  ;;  %s3337_s24 = int_to_ptr.vmem [resolvable:$false] %s3336_s24 }
 0x118   : > { %s3338_s18 = scalar_lea.vmem %s3337_s24, 1024  ;;  %p3339_p6 = scmp.lt.s32.totalorder %s4031_s19, %s3337_s24 }
 0x119   : > { %p3334_p8 = pnand %p3332_p2, %p3799_p4  ;;  %p3340_p13 = scmp.lt.s32.totalorder %s3338_s18, %s3331_s25 }
 0x11b   : > { %p3335_p0 = pneg %p3334_p8  ;;  %p3341_p11 = por %p3340_p13, %p3339_p6 }
 0x11d   : > { %p3342_p3 = pnand %p3341_p11, %p3335_p0 }
 0x11f   : > { %3345 = shalt.err (!%p3342_p3)
}
 0x120   : > { %2904 = dma.hbm_to_vmem [thread:$0]  (!%p4544_p9), %s4029_s14, 512, %s4031_s19, %s3793_s30, %s4540_s26, %s4540_s26, %s4539_s23  }
 0x121   : > { %s4062_s12 = scalar_lea.hbm %s4468_s11, %s3834_s0  ;;  %s648_s4 = scalar_lea.vmem [#allocation18], %s3732_s28 }
 0x122   : > { %s655_s20 = sshll.u32 %s648_s4, 4  ;;  %s4545_s3 = sld [smem:[#allocation41_spill]]  ;;  %s656_s20 = int_to_ptr.vmem [resolvable:$true] %s655_s20 }
 0x123   : > { %s3346_s16 = scalar_lea.hbm %s4062_s12, 16  ;;  %s3351_s19 = scalar_lea.hbm %s4468_s11, 32 }
 0x124   : > { %p3347_p10 = scmp.ne.s32.totalorder %s4062_s12, %s3346_s16  ;;  %p3352_p1 = scmp.lt.u32.totalorder %s4062_s12, %s4468_s11 }
 0x125   : > { %p3353_p5 = scmp.lt.u32.totalorder %s3351_s19, %s3346_s16  ;;  %p3355_p8 = scmp.lt.u32.totalorder %s3346_s16, %s4062_s12 }
 0x126   : > { %p3349_p7 = pnand %p3347_p10, %p3799_p4 }
 0x127   : > { %p3354_p2 = por %p3353_p5, %p3352_p1 }
 0x128   : > { %s4069_s2 = scalar_lea.hbm %s4545_s3, %s3834_s0  ;;  %p3350_p12 = pneg %p3349_p7 }
 0x129   : > { %p3356_p0 = por %p3355_p8, %p3354_p2 }
 0x12b   : > { %p3357_p6 = pnand %p3356_p0, %p3350_p12 }
 0x12d   : > { %3360 = shalt.err (!%p3357_p6)
}
 0x12e   : > { %s3361_s22 = scalar_lea.vmem %s656_s20, 16  ;;  %s3568_s24 = smov [#allocation18]  }
 0x12f   : > { %p3362_p13 = scmp.ne.s32.totalorder %s656_s20, %s3361_s22  ;;  %s3366_s18 = sshll.u32 %s3568_s24, 4  ;;  %s3367_s18 = int_to_ptr.vmem [resolvable:$false] %s3366_s18 }
 0x130   : > { %s3368_s15 = scalar_lea.vmem %s3367_s18, 32  ;;  %p3369_p10 = scmp.lt.s32.totalorder %s656_s20, %s3367_s18 }
 0x131   : > { %p3364_p11 = pnand %p3362_p13, %p3799_p4  ;;  %p3370_p7 = scmp.lt.s32.totalorder %s3368_s15, %s3361_s22 }
 0x133   : > { %p3365_p3 = pneg %p3364_p11  ;;  %p3371_p9 = por %p3370_p7, %p3369_p10 }
 0x135   : > { %p3372_p1 = pnand %p3371_p9, %p3365_p3 }
 0x137   : > { %3375 = shalt.err (!%p3372_p1)
}
 0x138   : > { %p4546_p5 = scmp.ne.s32.totalorder %s4526_s29, 0  ;;  %s665_s21 = scalar_lea.vmem [#allocation19], %s3732_s28 }
 0x139   : > { %s672_s4 = sshll.u32 %s665_s21, 4  ;;  %s3569_s13 = smov [#allocation7]   ;;  %s4090_s4 = int_to_ptr.vmem [resolvable:$true] %s672_s4 }
 0x13a   : > { %2907 = dma.hbm_to_vmem [thread:$0]  (!%p4546_p5), %s4062_s12, 16, %s656_s20, %s3793_s30  }
 0x13b   : > { %s465_s1 = sshll.u32 %s3569_s13, 4  ;;  %s3376_s16 = scalar_lea.hbm %s4069_s2, 16  ;;  %s466_s1 = int_to_ptr.vmem [resolvable:$true] %s465_s1 }
 0x13c   : > { %p3377_p9 = scmp.ne.s32.totalorder %s4069_s2, %s3376_s16  ;;  %s3381_s19 = scalar_lea.hbm %s4545_s3, 32 }
 0x13d   : > { %p3382_p8 = scmp.lt.u32.totalorder %s4069_s2, %s4545_s3  ;;  %p3383_p0 = scmp.lt.u32.totalorder %s3381_s19, %s3376_s16 }
 0x13e   : > { %p3379_p12 = pnand %p3377_p9, %p3799_p4  ;;  %p3385_p13 = scmp.lt.u32.totalorder %s3376_s16, %s4069_s2 }
 0x13f   : > { %p3384_p6 = por %p3383_p0, %p3382_p8 }
 0x140   : > { %p3380_p2 = pneg %p3379_p12 }
 0x141   : > { %p3386_p11 = por %p3385_p13, %p3384_p6 }
 0x143   : > { %p3387_p3 = pnand %p3386_p11, %p3380_p2 }
 0x145   : > { %3390 = shalt.err (!%p3387_p3)
}
 0x146   : > { %s3391_s12 = scalar_lea.vmem %s4090_s4, 16  ;;  %s3570_s20 = smov [#allocation19]  }
 0x147   : > { %p3392_p10 = scmp.ne.s32.totalorder %s4090_s4, %s3391_s12  ;;  %s3396_s22 = sshll.u32 %s3570_s20, 4  ;;  %s3397_s22 = int_to_ptr.vmem [resolvable:$false] %s3396_s22 }
 0x148   : > { %s3398_s24 = scalar_lea.vmem %s3397_s22, 32  ;;  %p3399_p9 = scmp.lt.s32.totalorder %s4090_s4, %s3397_s22 }
 0x149   : > { %p3394_p7 = pnand %p3392_p10, %p3799_p4  ;;  %p3400_p12 = scmp.lt.s32.totalorder %s3398_s24, %s3391_s12 }
 0x14b   : > { %p3395_p1 = pneg %p3394_p7  ;;  %p3401_p8 = por %p3400_p12, %p3399_p9 }
 0x14d   : > { %p3402_p0 = pnand %p3401_p8, %p3395_p1 }
 0x14f   : > { %3405 = shalt.err (!%p3402_p0)
}
 0x150   : > { %s4547_s18 = sld [smem:[#allocation33_spill]] }
 0x151   : > { %2910 = dma.hbm_to_vmem [thread:$0]  (!%p4546_p5), %s4069_s2, 16, %s4090_s4, %s3793_s30  }
 0x152   : > { %s4548_s13 = sld [smem:[#allocation37_spill]] }
 0x156   : > { %p4549_p6 = scmp.ne.s32.totalorder %s4547_s18, 0 }
 0x158   : > { %s3406_s16 = scalar_lea.hbm %s4548_s13, 32  ;;  %p4550_p13 = pneg %p4549_p6 }
 0x159   : > { %p3407_p2 = scmp.ne.s32.totalorder %s4548_s13, %s3406_s16  ;;  %p3413_p10 = scmp.lt.u32.totalorder %s3406_s16, %s4548_s13 }
 0x15b   : > { %p3409_p11 = pnand %p3407_p2, %p4550_p13 }
 0x15d   : > { %p3410_p3 = pneg %p3409_p11 }
 0x15f   : > { %p3415_p7 = pnand %p3413_p10, %p3410_p3 }
 0x161   : > { %3418 = shalt.err (!%p3415_p7)
}
 0x162   : > { %s3419_s2 = scalar_lea.vmem %s466_s1, 32  ;;  %p4551_p9 = pmov %p4550_p13 }
 0x163   : > { %p3420_p1 = scmp.ne.s32.totalorder %s466_s1, %s3419_s2  ;;  %p3427_p0 = scmp.lt.s32.totalorder %s466_s1, %s466_s1 }
 0x164   : > { %p3428_p5 = scmp.lt.s32.totalorder %s3419_s2, %s3419_s2 }
 0x165   : > { %p3422_p12 = pnand %p3420_p1, %p4551_p9 }
 0x166   : > { %p3429_p4 = por %p3428_p5, %p3427_p0 }
 0x167   : > { %p3423_p8 = pneg %p3422_p12 }
 0x169   : > { %p3430_p2 = pnand %p3429_p4, %p3423_p8 }
 0x16b   : > { %3433 = shalt.err (!%p3430_p2)
}
 0x16c   : > { %2876 = dma.hbm_to_vmem [thread:$0]  (!%p4549_p6), %s4548_s13, 32, %s466_s1, [#allocation8]  }
 0x16d   : > { %s4552_s22 = sld [smem:[#allocation42_spill]]  ;;  %s682_s15 = scalar_lea.vmem [#allocation20], %s3732_s28 }
 0x16e   : > { %s689_s21 = sshll.u32 %s682_s15, 4  ;;  %p4553_p5 = scmp.ne.s32.totalorder %s4532_s27, 0  ;;  %s690_s21 = int_to_ptr.vmem [resolvable:$true] %s689_s21 }
 0x173   : > { %s4138_s24 = scalar_lea.hbm %s4552_s22, %s3834_s0  ;;  %s3439_s1 = scalar_lea.hbm %s4552_s22, 32 }
 0x174   : > { %s3434_s18 = scalar_lea.hbm %s4138_s24, 16  ;;  %p3440_p6 = scmp.lt.u32.totalorder %s4138_s24, %s4552_s22 }
 0x175   : > { %p3435_p4 = scmp.ne.s32.totalorder %s4138_s24, %s3434_s18  ;;  %p3441_p3 = scmp.lt.u32.totalorder %s3439_s1, %s3434_s18 }
 0x176   : > { %p3443_p7 = scmp.lt.u32.totalorder %s3434_s18, %s4138_s24 }
 0x177   : > { %p3437_p13 = pnand %p3435_p4, %p4553_p5  ;;  %p3442_p10 = por %p3441_p3, %p3440_p6 }
 0x179   : > { %p3438_p11 = pneg %p3437_p13  ;;  %p3444_p1 = por %p3443_p7, %p3442_p10 }
 0x17b   : > { %p3445_p9 = pnand %p3444_p1, %p3438_p11 }
 0x17d   : > { %3448 = shalt.err (!%p3445_p9)
}
 0x17e   : > { %s3449_s28 = scalar_lea.vmem %s690_s21, 16  ;;  %s3571_s0 = smov [#allocation20]  }
 0x17f   : > { %p3450_p12 = scmp.ne.s32.totalorder %s690_s21, %s3449_s28  ;;  %s3454_s14 = sshll.u32 %s3571_s0, 4  ;;  %s3455_s14 = int_to_ptr.vmem [resolvable:$false] %s3454_s14 }
 0x180   : > { %s3456_s2 = scalar_lea.vmem %s3455_s14, 32  ;;  %p3457_p2 = scmp.lt.s32.totalorder %s690_s21, %s3455_s14 }
 0x181   : > { %p3452_p8 = pnand %p3450_p12, %p4553_p5  ;;  %p3458_p4 = scmp.lt.s32.totalorder %s3456_s2, %s3449_s28 }
 0x183   : > { %p3453_p0 = pneg %p3452_p8  ;;  %p3459_p13 = por %p3458_p4, %p3457_p2 }
 0x185   : > { %p3460_p3 = pnand %p3459_p13, %p3453_p0 }
 0x187   : > { %3463 = shalt.err (!%p3460_p3)
}
 0x188   : > { %p4554_p6 = scmp.ne.s32.totalorder %s4526_s29, 0  ;;  %s4555_s4 = sld [smem:[#allocation32_spill]] }
 0x18a   : > { %2913 = dma.hbm_to_vmem [thread:$0]  (!%p4554_p6), %s4138_s24, 16, %s690_s21, %s3793_s30  }
 0x18e   : > { %p4556_p11 = scmp.ne.s32.totalorder %s4555_s4, 0 }
 0x18f   : > { %s4557_s27 = sld [smem:[#allocation30_spill]] (!%p4556_p11) }
 0x190   : > { %698 = sbr.rel (%p4556_p11) target bundleno = 4628 (0x1214), region = 76 }
 0x195   : > { %p4558_p5 = scmp.eq.s32.totalorder (!%p4556_p11), %s4557_s27, 0 }
 0x197   : > { %3515 = dma.done.wait (%p4558_p5), [#allocation5], 256   ;;  %p4559_p10 = pmov %p4558_p5 }
 0x198   : > { %p4560_p7 = pmov %p4558_p5 }
 0x199   : > { %3517 = vsyncadd (%p4559_p10), [#allocation5], 4294967040 }
 0x19a   : > { %3519 = dma.done.wait (%p4560_p7), [#allocation8], 32   ;;  %p4561_p1 = pmov %p4558_p5 }
 0x19b   : > { %s4562_s29 = sld [smem:[#allocation26_spill]]  ;;  %s4563_s25 = sld [smem:[#allocation31_spill]] }
 0x19c   : > { %3521 = vsyncadd (%p4561_p1), [#allocation8], 4294967264  ;;  %s708_s12 = sand.u32 1, %s4557_s27  }
 0x19d   : > { %s709_s24 = scalar_lea.sflag [#allocation5], %s708_s12 }
 0x1a1   : > { %s4171_s30 = sand.u32 1, %s4562_s29   ;;  %p4564_p9 = scmp.ne.s32.totalorder %s4563_s25, 0 }
 0x1a2   : > { %s4174_s20 = sshll.u32 %s4171_s30, 4 }
 0x1a3   : > { %s712_s15 = scalar_lea.vmem [#allocation9], %s4174_s20 }
 0x1a4   : > { %3523 = dma.done.wait (%p4564_p9), %s709_s24, 1408  }
 0x1a5   : > { %3525 = vsyncadd (%p4564_p9), %s709_s24, 4294965888  ;;  %s2607_s21 = sshll.u32 %s4171_s30, 5  ;;  %s720_s18 = scalar_lea.vmem [#allocation10], %s4171_s30 }
 0x1a6   : > { %s729_s16 = scalar_lea.vmem [#allocation11], %s4174_s20  ;;  %s737_s23 = scalar_lea.vmem [#allocation12], %s4171_s30 }
 0x1a7   : > { %s745_s1 = scalar_lea.vmem [#allocation13], %s4171_s30  ;;  %s753_s26 = scalar_lea.vmem [#allocation14], %s4171_s30 }
 0x1a8   : > { %s762_s19 = scalar_lea.vmem [#allocation15], %s4174_s20  ;;  %s770_s28 = scalar_lea.vmem [#allocation16], %s4171_s30 }
 0x1a9   : > { %s4189_s0 = scalar_lea.vmem [#allocation17], %s2607_s21  ;;  %s787_s14 = scalar_lea.vmem [#allocation18], %s4171_s30 }
 0x1aa   : > { %s795_s2 = scalar_lea.vmem [#allocation19], %s4171_s30  ;;  %s803_s4 = scalar_lea.vmem [#allocation20], %s4171_s30 }
 0x1ab   : > { %s4565_s27 = sld [smem:[#allocation28_spill]] }
 0x1b1   : > { %p2608_p12 = scmp.ne.s32.totalorder %s4565_s27, 0 }
 0x1b2   : > { %v897_v0 = vld [vmem:[#allocation4] sm:$0xff] (!%p2608_p12)  ;;  %vm899_vm0 = vcmask (!%p2608_p12), 261120   ;;  %v898_v1 = vld [vmem:[#allocation4 + $0x8] sm:$0xff] (!%p2608_p12) }
 0x1b3   : > { %896 = sbr.rel (%p2608_p12) target bundleno = 442 (0x1ba), region = 136  ;;  %900 = vst.msk [vmem:[#allocation2] sm:$0xff] (!%p2608_p12), %vm899_vm0, %v897_v0  ;;  %901 = vst.msk [vmem:[#allocation2 + $0x8] sm:$0xff] (!%p2608_p12), %vm899_vm0, %v898_v1 }
 0x1ba PF: > { %v2994_v2 = vld [vmem:[%s712_s15] sm:$0xff]   ;;  %v3572_v3 = vmov 0.0   ;;  %v2995_v4 = vld [vmem:[%s712_s15 + $0x8] sm:$0xff]   ;;  %vm3573_vm1 = vmmov 0   ;;  %vm954_vm2 = vcmask 261120   ;;  %s3574_s29 = smov 96   ;;  %v911_v23 = vlaneseq }
 0x1bb   : > { %2702 = vmatprep.subr.bf16.mxu0 %v3572_v3  ;;  %2710 = vmatprep.subr.bf16.mxu1 %v3572_v3  ;;  %v4199_v5 = vld [vmem:[#allocation2] sm:$0xff]  ;;  %v4201_v6 = vld [vmem:[#allocation2 + $0x8] sm:$0xff]  ;;  %vm1004_vm3 = vcmask 64512   ;;  %v3575_v21 = vmov 1966171168   ;;  %s3576_s25 = smov 64  }
 0x1bc   : > { %2703 = vmatpush3.bf16.msra.mxu0 %v2994_v2  ;;  %2706 = vmatprep.mubr.msk.bf16.mxu0 %vm3573_vm1, %v3572_v3  ;;  %v930_v7 = vpack.c.bf16 %v4201_v6, %v4199_v5  ;;  %v2609_v8 = vld [vmem:[%s720_s18] ss:$0 sm:$0xff]  ;;  %v909_v22 = vunpack.c.l.s4 %v3575_v21  ;;  %v904_v24 = vld [vmem:[#allocation7] sm:$0x3]  ;;  %v912_v27 = vshrl.u32 %v911_v23, 7  ;;  %s3577_s12 = smov 88  }
 0x1bd   : > { %2704 = vmatprep.subr.bf16.mxu0 %v3572_v3  ;;  %2712 = vmatprep.mubr.msk.bf16.mxu1 %vm3573_vm1, %v3572_v3  ;;  %v905_v25 = vsub.f32 1.0, %v904_v24  ;;  %vm1143_vm4 = vcmask 1043456   ;;  %s3578_s24 = smov 120   ;;  %s3579_s15 = smov 56   ;;  %vm1469_vm5 = vcmask 130112   ;;  %vm1704_vm6 = vcmask 195712  }
 0x1be   : > { %v910_v26 = vunpack.c.0.s8 %v909_v22  ;;  %v1104_v32 = vsub.s32 0, %v912_v27  ;;  %s3580_s21 = smov 80   ;;  %s3581_s18 = smov 112   ;;  %vm1939_vm7 = vcmask 261312   ;;  %vm2185_vm8 = vcmask 523264  }
 0x1bf   : > { %v906_v28 = vmul.f32 -1e+09, %v905_v25  ;;  %s3582_s27 = smov 48   ;;  %s4566_s20 = sld [smem:[#allocation28_spill]] }
 0x1c0   : > { %2705 = vmatpush3.bf16.msra.mxu0 %v2995_v4  ;;  %v913_v29 = vsub.s32 %v910_v26, %v912_v27 }
 0x1c1   : > { %2716 = vmatprep.subr.bf16.mxu0 %v3572_v3 }
 0x1c2   : > { %v914_v30 = vrot.slane %v906_v28, %v913_v29 }
 0x1c3   : > { %2707 = vmatmul.mubr.msk.bf16.vlgmr.msra.gmra.mrb[0].mxu0 %vm954_vm2, %v930_v7 }
 0x1c4   : > { %2718 = vmatprep.mubr.msk.bf16.mxu0 %vm3573_vm1, %v3572_v3  ;;  %v922_v31 = vrot.slane %v914_v30, %v913_v29  ;;  %v915_v33 = vcombine.high %v914_v30, %v914_v30 }
 0x1c5   : > { %p2647_p8 = scmp.ne.s32.totalorder %s4566_s20, 1 }
 0x1c6   : > { %v4232_v34 = vrot.slane %v922_v31, %v1104_v32  ;;  %v929_v35 = vrot.slane %v915_v33, %v913_v29 }
 0x1c8   : > { %v4235_v42 = vrot.slane %v929_v35, %v1104_v32 }
 0x296   : > { %v992_v9 = vpop.f32.mrb[0].mxu0 }
 0x297   : > { %v993_v10 = vadd.f32 %v2609_v8, %v992_v9  ;;  %v2708_v11 = vpop.f32.mrb[1].mxu0 }
 0x298   : > { %v995_v12 = vpop.f32.mrb[2].mxu0 }
 0x299   : > { %v4214_v13 = vpack.c.bf16 %v993_v10, %v993_v10  ;;  %v996_v14 = vadd.f32 %v2609_v8, %v995_v12  ;;  %v2709_v15 = vpop.f32.mrb[3].mxu0 }
 0x29b   : > { %1002 = vrot.lane.b32.xlu0 %v4214_v13, %s3574_s29  ;;  %v4217_v16 = vpack.c.bf16 %v996_v14, %v996_v14 }
 0x29f   : > { %1052 = vrot.lane.b32.xlu0 %v4217_v16, %s3574_s29  ;;  %s3583_s29 = smov 72  }
 0x30d   : > { %v1003_v17 = vpop.permute.xlu0 %1002 }
 0x30e   : > { %v1009_v18 = vsel %vm1004_vm3, %v1003_v17, 0 }
 0x30f   : > { %2711 = vmatpush3.bf16.xpose.msra.mxu1 %v1009_v18 }
 0x310   : > { %2722 = vmatprep.subr.bf16.mxu1 %v3572_v3 }
 0x311   : > { %v1053_v19 = vpop.permute.xlu0 %1052 }
 0x312   : > { %v1058_v20 = vsel %vm1004_vm3, %v1053_v19, 0 }
 0x313   : > { %2717 = vmatpush3.bf16.xpose.msra.mxu0 %v1058_v20 }
 0x314   : > { %2728 = vmatprep.subr.bf16.mxu0 %v3572_v3 }
 0x316   : > { %2713 = vmatmul.mubr.msk.bf16.vlgmr.msra.gmra.mrb[0].mxu1 %vm1004_vm3, %v4214_v13 }
 0x317   : > { %2724 = vmatprep.mubr.msk.bf16.mxu1 %vm3573_vm1, %v3572_v3 }
 0x31a   : > { %2719 = vmatmul.mubr.msk.bf16.vlgmr.msra.gmra.mrb[4].mxu0 %vm1004_vm3, %v4217_v16 }
 0x31b   : > { %2730 = vmatprep.mubr.msk.bf16.mxu0 %vm3573_vm1, %v3572_v3 }
 0x3e9   : > { %v1045_v36 = vpop.f32.mrb[0].mxu1 }
 0x3ea   : > { %v1100_v37 = vmul.f32 0.35355338, %v1045_v36  ;;  %v2714_v38 = vpop.f32.mrb[1].mxu1 }
 0x3eb   : > { %v1048_v39 = vpop.f32.mrb[2].mxu1 }
 0x3ec   : > { %v2715_v40 = vpop.f32.mrb[3].mxu1  ;;  %v1112_v41 = vadd.f32 %v4232_v34, %v1100_v37 }
 0x3ed   : > { %v1094_v43 = vpop.f32.mrb[4].mxu0 }
 0x3ee   : > { %v1101_v44 = vmul.f32 0.35355338, %v1094_v43  ;;  %v2720_v45 = vpop.f32.mrb[5].mxu0  ;;  %v1114_v46 = vsel %vm1004_vm3, %v1112_v41, -inf }
 0x3ef   : > { %1115 = vmax.xlane.f32.xlu1 %v1114_v46  ;;  %v1097_v47 = vpop.f32.mrb[6].mxu0 }
 0x3f0   : > { %v2721_v48 = vpop.f32.mrb[7].mxu0  ;;  %v1113_v49 = vadd.f32 %v4235_v42, %v1101_v44 }
 0x3f2   : > { %v1117_v50 = vsel %vm1004_vm3, %v1113_v49, -inf }
 0x3f3   : > { %1118 = vmax.xlane.f32.xlu1 %v1117_v50 }
 0x404   : > { %1138 = vrot.lane.b32.xlu1 %v4214_v13, %s3576_s25 }
 0x408   : > { %1187 = vrot.lane.b32.xlu1 %v4217_v16, %s3576_s25  ;;  %s3584_s25 = smov 104  }
 0x40c   : > { %1239 = vrot.lane.b32.xlu1 %v4214_v13, %s3577_s12 }
 0x47c   : > { %v1116_v51 = vpop.xlane.xlu1 %1115 }
 0x47d   : > { %v1120_v52 = vsub.f32 %v1112_v41, %v1116_v51 }
 0x47f   : > { %v1122_v53 = vmul.f32 1.442695, %v1120_v52 }
 0x480   : > { %v1119_v54 = vpop.xlane.xlu1 %1118 }
 0x481   : > { %3004 = vpow2.f32 %v1122_v53  ;;  %v1121_v55 = vsub.f32 %v1113_v49, %v1119_v54 }
 0x483   : > { %v1124_v56 = vmul.f32 1.442695, %v1121_v55 }
 0x484   : > { %v1139_v57 = vpop.permute.xlu1 %1138 }
 0x485   : > { %3006 = vpow2.f32 %v1124_v56  ;;  %v1145_v58 = vsel %vm1143_vm4, %v1139_v57, 0 }
 0x486   : > { %2723 = vmatpush3.bf16.msra.mxu1 %v1145_v58 }
 0x487   : > { %2734 = vmatprep.subr.bf16.mxu1 %v3572_v3 }
 0x488   : > { %v1188_v59 = vpop.permute.xlu1 %1187 }
 0x489   : > { %v1193_v60 = vsel %vm1143_vm4, %v1188_v59, 0 }
 0x48a   : > { %2729 = vmatpush3.bf16.msra.mxu0 %v1193_v60 }
 0x48b   : > { %v3005_v61 = vpop.eup %3004  ;;  %2740 = vmatprep.subr.bf16.mxu0 %v3572_v3 }
 0x48c   : > { %v1126_v62 = vsel %vm1004_vm3, %v3005_v61, 0.0  ;;  %v1240_v1 = vpop.permute.xlu1 %1239 }
 0x48d   : > { %1127 = vadd.xlane.f32.xlu0 %v1126_v62  ;;  %v1245_v11 = vsel %vm1004_vm3, %v1240_v1, 0 }
 0x48f   : > { %v3007_v63 = vpop.eup %3006 }
 0x490   : > { %v1129_v0 = vsel %vm1004_vm3, %v3007_v63, 0.0 }
 0x491   : > { %1130 = vadd.xlane.f32.xlu1 %v1129_v0 }
 0x4a2   : > { %1289 = vrot.lane.b32.xlu1 %v4217_v16, %s3577_s12  ;;  %s3585_s12 = smov 40  }
 0x4a3   : > { %1237 = vrot.lane.b32.xlu0 %v4214_v13, %s3578_s24 }
 0x4a6   : > { %1287 = vrot.lane.b32.xlu1 %v4217_v16, %s3578_s24  ;;  %s3586_s24 = smov 8  }
 0x51a   : > { %v1128_v2 = vpop.xlane.xlu0 %1127 }
 0x51b   : > { %3008 = vrcp.f32 %v1128_v2 }
 0x51e   : > { %v1131_v4 = vpop.xlane.xlu1 %1130  ;;  %v1238_v18 = vpop.permute.xlu0 %1237 }
 0x51f   : > { %3010 = vrcp.f32 %v1131_v4 }
 0x522   : > { %v1290_v14 = vpop.permute.xlu1 %1289 }
 0x523   : > { %v1295_v17 = vsel %vm1004_vm3, %v1290_v14, 0 }
 0x525   : > { %v3009_v7 = vpop.eup %3008 }
 0x526   : > { %v1134_v8 = vmul.f32 %v3009_v7, %v3005_v61  ;;  %v1288_v19 = vpop.permute.xlu1 %1287 }
 0x528   : > { %v1136_v9 = vpack.c.bf16 %v1134_v8, %v1134_v8 }
 0x529   : > { %v3011_v10 = vpop.eup %3010 }
 0x52a   : > { %v1135_v12 = vmul.f32 %v3011_v10, %v3007_v63  ;;  %2725 = vmatmul.mubr.msk.bf16.vlgmr.msra.gmra.mrb[4].mxu1 %vm1004_vm3, %v1136_v9 }
 0x52b   : > { %2735 = vmatpush3.bf16.xpose.msra.mxu1 %v1245_v11  ;;  %2736 = vmatprep.mubr.msk.bf16.mxu1 %vm3573_vm1, %v3572_v3 }
 0x52c   : > { %v1137_v15 = vpack.c.bf16 %v1135_v12, %v1135_v12  ;;  %2746 = vmatprep.subr.bf16.mxu1 %v3572_v3 }
 0x52e   : > { %2731 = vmatmul.mubr.msk.bf16.vlgmr.msra.gmra.mrb[8].mxu0 %vm1004_vm3, %v1137_v15 }
 0x52f   : > { %2741 = vmatpush3.bf16.xpose.msra.mxu0 %v1295_v17  ;;  %2742 = vmatprep.mubr.msk.bf16.mxu0 %vm3573_vm1, %v3572_v3 }
 0x530   : > { %2752 = vmatprep.subr.bf16.mxu0 %v3572_v3 }
 0x532   : > { %2737 = vmatmul.mubr.msk.bf16.vlgmr.msra.gmra.mrb[8].mxu1 %vm1004_vm3, %v1238_v18 }
 0x533   : > { %2748 = vmatprep.mubr.msk.bf16.mxu1 %vm3573_vm1, %v3572_v3 }
 0x536   : > { %2743 = vmatmul.mubr.msk.bf16.vlgmr.msra.gmra.mrb[12].mxu0 %vm1004_vm3, %v1288_v19 }
 0x537   : > { %2754 = vmatprep.mubr.msk.bf16.mxu0 %vm3573_vm1, %v3572_v3 }
 0x5fd   : > { %v1181_v20 = vpop.f32.mrb[4].mxu1 }
 0x5fe   : > { %1235 = vst.msk [vmem:[#allocation3] sm:$0xff] %vm1004_vm3, %v1181_v20  ;;  %v2726_v21 = vpop.f32.mrb[5].mxu1 }
 0x5ff   : > { %v1184_v22 = vpop.f32.mrb[6].mxu1 }
 0x600   : > { %v2727_v23 = vpop.f32.mrb[7].mxu1 }
 0x601   : > { %v1229_v24 = vpop.f32.mrb[8].mxu0 }
 0x602   : > { %1236 = vst.msk [vmem:[#allocation3 + $0x8] sm:$0xff] %vm1004_vm3, %v1229_v24  ;;  %v2732_v25 = vpop.f32.mrb[9].mxu0 }
 0x603   : > { %v1232_v26 = vpop.f32.mrb[10].mxu0 }
 0x604   : > { %v2733_v27 = vpop.f32.mrb[11].mxu0 }
 0x605   : > { %v1281_v28 = vpop.f32.mrb[8].mxu1 }
 0x606   : > { %v1337_v29 = vmul.f32 0.35355338, %v1281_v28  ;;  %v2738_v30 = vpop.f32.mrb[9].mxu1 }
 0x607   : > { %v1284_v31 = vpop.f32.mrb[10].mxu1 }
 0x608   : > { %v2739_v32 = vpop.f32.mrb[11].mxu1  ;;  %v1339_v33 = vadd.f32 %v1337_v29, %v4232_v34 }
 0x609   : > { %v1331_v35 = vpop.f32.mrb[12].mxu0 }
 0x60a   : > { %v1338_v36 = vmul.f32 0.35355338, %v1331_v35  ;;  %v2744_v37 = vpop.f32.mrb[13].mxu0  ;;  %v1341_v38 = vsel %vm1004_vm3, %v1339_v33, -inf }
 0x60b   : > { %1342 = vmax.xlane.f32.xlu1 %v1341_v38  ;;  %v1334_v39 = vpop.f32.mrb[14].mxu0 }
 0x60c   : > { %v2745_v40 = vpop.f32.mrb[15].mxu0  ;;  %v1340_v41 = vadd.f32 %v1338_v36, %v4235_v42 }
 0x60e   : > { %v1344_v43 = vsel %vm1004_vm3, %v1340_v41, -inf }
 0x60f   : > { %1345 = vmax.xlane.f32.xlu0 %v1344_v43 }
 0x61c   : > { %1365 = vrot.lane.b32.xlu1 %v4214_v13, %s3579_s15 }
 0x620   : > { %1474 = vrot.lane.b32.xlu1 %v4214_v13, %s3580_s21 }
 0x625   : > { %1413 = vrot.lane.b32.xlu0 %v4217_v16, %s3579_s15  ;;  %s3587_s15 = smov 16  }
 0x629   : > { %1472 = vrot.lane.b32.xlu0 %v4214_v13, %s3581_s18 }
 0x698   : > { %v1343_v44 = vpop.xlane.xlu1 %1342 }
 0x699   : > { %v1347_v45 = vsub.f32 %v1339_v33, %v1343_v44 }
 0x69b   : > { %v1349_v46 = vmul.f32 1.442695, %v1347_v45 }
 0x69c   : > { %v1366_v47 = vpop.permute.xlu1 %1365  ;;  %v1346_v48 = vpop.xlane.xlu0 %1345 }
 0x69d   : > { %3012 = vpow2.f32 %v1349_v46  ;;  %v1371_v49 = vsel %vm1143_vm4, %v1366_v47, 0  ;;  %v1348_v50 = vsub.f32 %v1340_v41, %v1346_v48 }
 0x69e   : > { %2747 = vmatpush3.bf16.msra.mxu1 %v1371_v49 }
 0x69f   : > { %v1351_v51 = vmul.f32 1.442695, %v1348_v50  ;;  %2758 = vmatprep.subr.bf16.mxu1 %v3572_v3 }
 0x6a0   : > { %v1414_v52 = vpop.permute.xlu0 %1413  ;;  %v1475_v58 = vpop.permute.xlu1 %1474 }
 0x6a1   : > { %3014 = vpow2.f32 %v1351_v51  ;;  %v1419_v53 = vsel %vm1143_vm4, %v1414_v52, 0  ;;  %v1480_v1 = vsel %vm1004_vm3, %v1475_v58, 0 }
 0x6a2   : > { %2753 = vmatpush3.bf16.msra.mxu0 %v1419_v53 }
 0x6a3   : > { %2764 = vmatprep.subr.bf16.mxu0 %v3572_v3 }
 0x6a4   : > { %v1473_v9 = vpop.permute.xlu0 %1472 }
 0x6a7   : > { %v3013_v54 = vpop.eup %3012 }
 0x6a8   : > { %v1353_v55 = vsel %vm1004_vm3, %v3013_v54, 0.0 }
 0x6a9   : > { %1354 = vadd.xlane.f32.xlu1 %v1353_v55 }
 0x6ab   : > { %v3015_v56 = vpop.eup %3014 }
 0x6ac   : > { %v1356_v57 = vsel %vm1004_vm3, %v3015_v56, 0.0 }
 0x6ad   : > { %1357 = vadd.xlane.f32.xlu1 %v1356_v57 }
 0x6be   : > { %1524 = vrot.lane.b32.xlu1 %v4217_v16, %s3580_s21  ;;  %s3588_s21 = smov 24  }
 0x6c2   : > { %1522 = vrot.lane.b32.xlu1 %v4217_v16, %s3581_s18 }
 0x736   : > { %v1355_v59 = vpop.xlane.xlu1 %1354 }
 0x737   : > { %3016 = vrcp.f32 %v1355_v59 }
 0x73a   : > { %v1358_v60 = vpop.xlane.xlu1 %1357 }
 0x73b   : > { %3018 = vrcp.f32 %v1358_v60 }
 0x73e   : > { %v1525_v4 = vpop.permute.xlu1 %1524 }
 0x73f   : > { %v1530_v8 = vsel %vm1004_vm3, %v1525_v4, 0 }
 0x741   : > { %v3017_v61 = vpop.eup %3016 }
 0x742   : > { %v1361_v62 = vmul.f32 %v3017_v61, %v3013_v54  ;;  %v1523_v10 = vpop.permute.xlu1 %1522 }
 0x744   : > { %v1363_v63 = vpack.c.bf16 %v1361_v62, %v1361_v62 }
 0x745   : > { %v3019_v0 = vpop.eup %3018 }
 0x746   : > { %v1362_v2 = vmul.f32 %v3019_v0, %v3015_v56  ;;  %2749 = vmatmul.mubr.msk.bf16.vlgmr.msra.gmra.mrb[12].mxu1 %vm1004_vm3, %v1363_v63 }
 0x747   : > { %2759 = vmatpush3.bf16.xpose.msra.mxu1 %v1480_v1  ;;  %2760 = vmatprep.mubr.msk.bf16.mxu1 %vm3573_vm1, %v3572_v3 }
 0x748   : > { %v1364_v7 = vpack.c.bf16 %v1362_v2, %v1362_v2  ;;  %2770 = vmatprep.subr.bf16.mxu1 %v3572_v3 }
 0x74a   : > { %2755 = vmatmul.mubr.msk.bf16.vlgmr.msra.gmra.mrb[16].mxu0 %vm1004_vm3, %v1364_v7 }
 0x74b   : > { %2765 = vmatpush3.bf16.xpose.msra.mxu0 %v1530_v8  ;;  %2766 = vmatprep.mubr.msk.bf16.mxu0 %vm3573_vm1, %v3572_v3 }
 0x74c   : > { %2776 = vmatprep.subr.bf16.mxu0 %v3572_v3 }
 0x74e   : > { %2761 = vmatmul.mubr.msk.bf16.vlgmr.msra.gmra.mrb[16].mxu1 %vm1004_vm3, %v1473_v9 }
 0x74f   : > { %2772 = vmatprep.mubr.msk.bf16.mxu1 %vm3573_vm1, %v3572_v3 }
 0x752   : > { %2767 = vmatmul.mubr.msk.bf16.vlgmr.msra.gmra.mrb[20].mxu0 %vm1004_vm3, %v1523_v10 }
 0x753   : > { %2778 = vmatprep.mubr.msk.bf16.mxu0 %vm3573_vm1, %v3572_v3 }
 0x819   : > { %v4302_v11 = vpop.f32.mrb[12].mxu1 }
 0x81a   : > { %v2750_v12 = vpop.f32.mrb[13].mxu1 }
 0x81b   : > { %v1410_v14 = vpop.f32.mrb[14].mxu1 }
 0x81c   : > { %v2751_v15 = vpop.f32.mrb[15].mxu1 }
 0x81d   : > { %v4304_v17 = vpop.f32.mrb[16].mxu0 }
 0x81e   : > { %v2756_v18 = vpop.f32.mrb[17].mxu0 }
 0x81f   : > { %v1458_v19 = vpop.f32.mrb[18].mxu0 }
 0x820   : > { %v2757_v20 = vpop.f32.mrb[19].mxu0 }
 0x821   : > { %v1516_v21 = vpop.f32.mrb[16].mxu1 }
 0x822   : > { %v1572_v22 = vmul.f32 0.35355338, %v1516_v21  ;;  %v2762_v23 = vpop.f32.mrb[17].mxu1 }
 0x823   : > { %v1519_v24 = vpop.f32.mrb[18].mxu1 }
 0x824   : > { %v2763_v25 = vpop.f32.mrb[19].mxu1  ;;  %v1574_v26 = vadd.f32 %v1572_v22, %v4232_v34 }
 0x825   : > { %v1566_v27 = vpop.f32.mrb[20].mxu0 }
 0x826   : > { %v1573_v28 = vmul.f32 0.35355338, %v1566_v27  ;;  %v2768_v29 = vpop.f32.mrb[21].mxu0  ;;  %v1576_v30 = vsel %vm1004_vm3, %v1574_v26, -inf }
 0x827   : > { %1577 = vmax.xlane.f32.xlu0 %v1576_v30  ;;  %v1569_v31 = vpop.f32.mrb[22].mxu0 }
 0x828   : > { %v2769_v32 = vpop.f32.mrb[23].mxu0  ;;  %v1575_v33 = vadd.f32 %v1573_v28, %v4235_v42 }
 0x82a   : > { %v1579_v35 = vsel %vm1004_vm3, %v1575_v33, -inf }
 0x82b   : > { %1580 = vmax.xlane.f32.xlu1 %v1579_v35 }
 0x83c   : > { %1600 = vrot.lane.b32.xlu1 %v4214_v13, %s3582_s27 }
 0x840   : > { %1709 = vrot.lane.b32.xlu1 %v4214_v13, %s3583_s29 }
 0x844   : > { %1759 = vrot.lane.b32.xlu1 %v4217_v16, %s3583_s29 }
 0x848   : > { %1757 = vrot.lane.b32.xlu1 %v4217_v16, %s3584_s25 }
 0x8b4   : > { %v1578_v36 = vpop.xlane.xlu0 %1577 }
 0x8b5   : > { %v1582_v37 = vsub.f32 %v1574_v26, %v1578_v36 }
 0x8b7   : > { %v1584_v38 = vmul.f32 1.442695, %v1582_v37 }
 0x8b8   : > { %v1581_v39 = vpop.xlane.xlu1 %1580 }
 0x8b9   : > { %3020 = vpow2.f32 %v1584_v38  ;;  %v1583_v40 = vsub.f32 %v1575_v33, %v1581_v39 }
 0x8bb   : > { %v1586_v41 = vmul.f32 1.442695, %v1583_v40 }
 0x8bc   : > { %v1601_v43 = vpop.permute.xlu1 %1600 }
 0x8bd   : > { %3022 = vpow2.f32 %v1586_v41  ;;  %v1606_v44 = vsel %vm1143_vm4, %v1601_v43, 0 }
 0x8be   : > { %2771 = vmatpush3.bf16.msra.mxu1 %v1606_v44 }
 0x8bf   : > { %2782 = vmatprep.subr.bf16.mxu1 %v3572_v3 }
 0x8c0   : > { %v1710_v54 = vpop.permute.xlu1 %1709 }
 0x8c1   : > { %v1715_v58 = vsel %vm1004_vm3, %v1710_v54, 0 }
 0x8c3   : > { %v3021_v45 = vpop.eup %3020 }
 0x8c4   : > { %v1588_v46 = vsel %vm1004_vm3, %v3021_v45, 0.0  ;;  %v1760_v60 = vpop.permute.xlu1 %1759 }
 0x8c5   : > { %1589 = vadd.xlane.f32.xlu0 %v1588_v46  ;;  %v1765_v62 = vsel %vm1004_vm3, %v1760_v60, 0 }
 0x8c7   : > { %v3023_v47 = vpop.eup %3022 }
 0x8c8   : > { %v1591_v48 = vsel %vm1004_vm3, %v3023_v47, 0.0  ;;  %v1758_v0 = vpop.permute.xlu1 %1757 }
 0x8c9   : > { %1592 = vadd.xlane.f32.xlu0 %v1591_v48 }
 0x8df   : > { %1648 = vrot.lane.b32.xlu0 %v4217_v16, %s3582_s27 }
 0x8e3   : > { %1707 = vrot.lane.b32.xlu0 %v4214_v13, %s3584_s25 }
 0x952   : > { %v1590_v49 = vpop.xlane.xlu0 %1589 }
 0x953   : > { %3024 = vrcp.f32 %v1590_v49 }
 0x956   : > { %v1593_v50 = vpop.xlane.xlu0 %1592 }
 0x957   : > { %3026 = vrcp.f32 %v1593_v50 }
 0x95a   : > { %v1649_v51 = vpop.permute.xlu0 %1648 }
 0x95b   : > { %v1654_v52 = vsel %vm1143_vm4, %v1649_v51, 0 }
 0x95c   : > { %2777 = vmatpush3.bf16.msra.mxu0 %v1654_v52  ;;  %v2996_v52 = vld [vmem:[%s729_s16] sm:$0xff]  }
 0x95d   : > { %v3025_v53 = vpop.eup %3024  ;;  %2788 = vmatprep.subr.bf16.mxu0 %v3572_v3 }
 0x95e   : > { %v1596_v55 = vmul.f32 %v3025_v53, %v3021_v45  ;;  %v1708_v63 = vpop.permute.xlu0 %1707  ;;  %v2997_v53 = vld [vmem:[%s729_s16 + $0x8] sm:$0xff]  }
 0x960   : > { %v1598_v56 = vpack.c.bf16 %v1596_v55, %v1596_v55 }
 0x961   : > { %v3027_v57 = vpop.eup %3026 }
 0x962   : > { %v1597_v59 = vmul.f32 %v3027_v57, %v3023_v47  ;;  %2773 = vmatmul.mubr.msk.bf16.vlgmr.msra.gmra.mrb[20].mxu1 %vm1004_vm3, %v1598_v56 }
 0x963   : > { %2783 = vmatpush3.bf16.xpose.msra.mxu1 %v1715_v58  ;;  %2784 = vmatprep.mubr.msk.bf16.mxu1 %vm3573_vm1, %v3572_v3 }
 0x964   : > { %v1599_v61 = vpack.c.bf16 %v1597_v59, %v1597_v59  ;;  %2794 = vmatprep.subr.bf16.mxu1 %v3572_v3 }
 0x966   : > { %2779 = vmatmul.mubr.msk.bf16.vlgmr.msra.gmra.mrb[24].mxu0 %vm1004_vm3, %v1599_v61 }
 0x967   : > { %2789 = vmatpush3.bf16.xpose.msra.mxu0 %v1765_v62  ;;  %2790 = vmatprep.mubr.msk.bf16.mxu0 %vm3573_vm1, %v3572_v3 }
 0x968   : > { %2800 = vmatprep.subr.bf16.mxu0 %v3572_v3 }
 0x96a   : > { %2785 = vmatmul.mubr.msk.bf16.vlgmr.msra.gmra.mrb[24].mxu1 %vm1004_vm3, %v1708_v63 }
 0x96b   : > { %2796 = vmatprep.mubr.msk.bf16.mxu1 %vm3573_vm1, %v3572_v3 }
 0x96e   : > { %2791 = vmatmul.mubr.msk.bf16.vlgmr.msra.gmra.mrb[28].mxu0 %vm1004_vm3, %v1758_v0 }
 0x96f   : > { %2802 = vmatprep.mubr.msk.bf16.mxu0 %vm3573_vm1, %v3572_v3 }
 0xa35   : > { %v1642_v1 = vpop.f32.mrb[20].mxu1 }
 0xa36   : > { %v2774_v2 = vpop.f32.mrb[21].mxu1 }
 0xa37   : > { %v1645_v4 = vpop.f32.mrb[22].mxu1 }
 0xa38   : > { %v2775_v7 = vpop.f32.mrb[23].mxu1  ;;  %v2629_v4 = vld [vmem:[%s737_s23] ss:$0 sm:$0xff] }
 0xa39   : > { %v1690_v8 = vpop.f32.mrb[24].mxu0 }
 0xa3a   : > { %v2780_v9 = vpop.f32.mrb[25].mxu0 }
 0xa3b   : > { %v1693_v10 = vpop.f32.mrb[26].mxu0 }
 0xa3c   : > { %v2781_v12 = vpop.f32.mrb[27].mxu0 }
 0xa3d   : > { %v1751_v14 = vpop.f32.mrb[24].mxu1 }
 0xa3e   : > { %v1807_v15 = vmul.f32 0.35355338, %v1751_v14  ;;  %v2786_v18 = vpop.f32.mrb[25].mxu1 }
 0xa3f   : > { %v1754_v19 = vpop.f32.mrb[26].mxu1 }
 0xa40   : > { %v2787_v20 = vpop.f32.mrb[27].mxu1  ;;  %v1809_v21 = vadd.f32 %v1807_v15, %v4232_v34 }
 0xa41   : > { %v1801_v22 = vpop.f32.mrb[28].mxu0 }
 0xa42   : > { %v1808_v23 = vmul.f32 0.35355338, %v1801_v22  ;;  %v2792_v24 = vpop.f32.mrb[29].mxu0  ;;  %v1811_v25 = vsel %vm1004_vm3, %v1809_v21, -inf }
 0xa43   : > { %1812 = vmax.xlane.f32.xlu0 %v1811_v25  ;;  %v1804_v26 = vpop.f32.mrb[30].mxu0 }
 0xa44   : > { %v2793_v27 = vpop.f32.mrb[31].mxu0  ;;  %v1810_v28 = vadd.f32 %v1808_v23, %v4235_v42 }
 0xa46   : > { %v1814_v29 = vsel %vm1004_vm3, %v1810_v28, -inf }
 0xa47   : > { %1815 = vmax.xlane.f32.xlu1 %v1814_v29 }
 0xa58   : > { %1835 = vrot.lane.b32.xlu1 %v4214_v13, %s3585_s12 }
 0xa5c   : > { %1463 = vrot.lane.b32.xlu1 %v4302_v11, %s3586_s24 }
 0xa60   : > { %1465 = vrot.lane.b32.xlu1 %v4304_v17, %s3586_s24 }
 0xa64   : > { %1700 = vrot.lane.b32.xlu1 %v1690_v8, %s3587_s15 }
 0xad0   : > { %v1813_v34 = vpop.xlane.xlu0 %1812 }
 0xad1   : > { %v1817_v30 = vsub.f32 %v1809_v21, %v1813_v34  ;;  %v2999_v34 = vld [vmem:[%s762_s19 + $0x8] sm:$0xff]  }
 0xad3   : > { %v1819_v31 = vmul.f32 1.442695, %v1817_v30 }
 0xad4   : > { %v1816_v42 = vpop.xlane.xlu1 %1815 }
 0xad5   : > { %3028 = vpow2.f32 %v1819_v31  ;;  %v1818_v32 = vsub.f32 %v1810_v28, %v1816_v42 }
 0xad7   : > { %v1821_v33 = vmul.f32 1.442695, %v1818_v32 }
 0xad8   : > { %v1836_v35 = vpop.permute.xlu1 %1835 }
 0xad9   : > { %3030 = vpow2.f32 %v1821_v33  ;;  %v1841_v13 = vsel %vm1143_vm4, %v1836_v35, 0 }
 0xada   : > { %2795 = vmatpush3.bf16.msra.mxu1 %v1841_v13 }
 0xadb   : > { %2806 = vmatprep.subr.bf16.mxu1 %v3572_v3 }
 0xadc   : > { %v1464_v11 = vpop.permute.xlu1 %1463 }
 0xadd   : > { %1470 = vst.msk [vmem:[#allocation3] sm:$0xff] %vm1469_vm5, %v1464_v11 }
 0xadf   : > { %v3029_v17 = vpop.eup %3028 }
 0xae0   : > { %v1466_v36 = vpop.permute.xlu1 %1465  ;;  %v1823_v37 = vsel %vm1004_vm3, %v3029_v17, 0.0 }
 0xae1   : > { %1471 = vst.msk [vmem:[#allocation3 + $0x8] sm:$0xff] %vm1469_vm5, %v1466_v36  ;;  %1824 = vadd.xlane.f32.xlu0 %v1823_v37 }
 0xae3   : > { %v3031_v38 = vpop.eup %3030 }
 0xae4   : > { %v1701_v39 = vpop.permute.xlu1 %1700  ;;  %v1826_v40 = vsel %vm1004_vm3, %v3031_v38, 0.0 }
 0xae5   : > { %1706 = vst.msk [vmem:[#allocation3 + $0x8] sm:$0xff] %vm1704_vm6, %v1701_v39  ;;  %1827 = vadd.xlane.f32.xlu0 %v1826_v40  ;;  %v2634_v39 = vld [vmem:[%s753_s26] ss:$0 sm:$0xff] }
 0xafb   : > { %1883 = vrot.lane.b32.xlu0 %v4217_v16, %s3585_s12 }
 0xaff   : > { %1698 = vrot.lane.b32.xlu0 %v1642_v1, %s3587_s15 }
 0xb6e   : > { %v1825_v41 = vpop.xlane.xlu0 %1824 }
 0xb6f   : > { %3032 = vrcp.f32 %v1825_v41 }
 0xb72   : > { %v1828_v43 = vpop.xlane.xlu0 %1827 }
 0xb73   : > { %3034 = vrcp.f32 %v1828_v43 }
 0xb76   : > { %v1884_v44 = vpop.permute.xlu0 %1883 }
 0xb77   : > { %v1889_v45 = vsel %vm1143_vm4, %v1884_v44, 0 }
 0xb78   : > { %2801 = vmatpush3.bf16.msra.mxu0 %v1889_v45  ;;  %v3000_v45 = vld [vmem:[%s4189_s0] sm:$0xff]  }
 0xb79   : > { %v3033_v46 = vpop.eup %3032  ;;  %2814 = vmatprep.subr.bf16.mxu0 %v3572_v3 }
 0xb7a   : > { %v1831_v47 = vmul.f32 %v3033_v46, %v3029_v17  ;;  %v1699_v48 = vpop.permute.xlu0 %1698  ;;  %v2633_v17 = vld [vmem:[%s745_s1] ss:$0 sm:$0xff]  ;;  %v3001_v46 = vld [vmem:[%s4189_s0 + $0x8] sm:$0xff]  }
 0xb7b   : > { %1705 = vst.msk [vmem:[#allocation3] sm:$0xff] %vm1704_vm6, %v1699_v48  ;;  %v3003_v48 = vld [vmem:[%s4189_s0 + $0x18] sm:$0xff]  }
 0xb7c   : > { %v1833_v49 = vpack.c.bf16 %v1831_v47, %v1831_v47  ;;  %v3002_v47 = vld [vmem:[%s4189_s0 + $0x10] sm:$0xff]  }
 0xb7d   : > { %v3035_v16 = vpop.eup %3034 }
 0xb7e   : > { %v1832_v50 = vmul.f32 %v3035_v16, %v3031_v38  ;;  %2797 = vmatmul.mubr.msk.bf16.vlgmr.msra.gmra.mrb[28].mxu1 %vm1004_vm3, %v1833_v49  ;;  %v2635_v49 = vld [vmem:[%s770_s28] ss:$0 sm:$0xff] }
 0xb7f   : > { %2810 = vmatprep.mubr.msk.bf16.mxu1 %vm3573_vm1, %v3572_v3  ;;  %2807 = vmatpush3.bf16.msra.mxu1 %v2996_v52 }
 0xb80   : > { %v1834_v51 = vpack.c.bf16 %v1832_v50, %v1832_v50  ;;  %2808 = vmatprep.subr.bf16.mxu1 %v3572_v3 }
 0xb82   : > { %2803 = vmatmul.mubr.msk.bf16.vlgmr.msra.gmra.mrb[32].mxu0 %vm1004_vm3, %v1834_v51 }
 0xb83   : > { %2818 = vmatprep.mubr.msk.bf16.mxu0 %vm3573_vm1, %v3572_v3  ;;  %2809 = vmatpush3.bf16.msra.mxu1 %v2997_v53 }
 0xb84   : > { %2822 = vmatprep.subr.bf16.mxu1 %v3572_v3 }
 0xc51   : > { %v1877_v54 = vpop.f32.mrb[28].mxu1 }
 0xc52   : > { %1933 = vrot.lane.b32.xlu0 %v1877_v54, %s3588_s21  ;;  %v2798_v55 = vpop.f32.mrb[29].mxu1 }
 0xc53   : > { %v1880_v56 = vpop.f32.mrb[30].mxu1 }
 0xc54   : > { %v2799_v57 = vpop.f32.mrb[31].mxu1 }
 0xc55   : > { %v1925_v58 = vpop.f32.mrb[32].mxu0 }
 0xc56   : > { %1935 = vrot.lane.b32.xlu1 %v1925_v58, %s3588_s21  ;;  %v2804_v59 = vpop.f32.mrb[33].mxu0 }
 0xc57   : > { %v1928_v60 = vpop.f32.mrb[34].mxu0 }
 0xc58   : > { %v2805_v61 = vpop.f32.mrb[35].mxu0 }
 0xcc4   : > { %v1934_v62 = vpop.permute.xlu0 %1933 }
 0xcc5   : > { %1940 = vst.msk [vmem:[#allocation3] sm:$0xff] %vm1939_vm7, %v1934_v62 }
 0xcc8   : > { %v1936_v63 = vpop.permute.xlu1 %1935 }
 0xcc9   : > { %1941 = vst.msk [vmem:[#allocation3 + $0x8] sm:$0xff] %vm1939_vm7, %v1936_v63 }
 0xccc   : > { %v1942_v0 = vld [vmem:[#allocation3] sm:$0xff] }
 0xcd0   : > { %v1943_v1 = vld [vmem:[#allocation3 + $0x8] sm:$0xff] }
 0xcd1   : > { %v1944_v2 = vpack.c.bf16 %v1943_v1, %v1942_v0 }
 0xcd3   : > { %2811 = vmatmul.mubr.msk.bf16.vlgmr.msra.gmra.mrb[32].mxu1 %vm954_vm2, %v1944_v2 }
 0xcd4   : > { %2830 = vmatprep.mubr.msk.bf16.mxu1 %vm3573_vm1, %v3572_v3  ;;  %2823 = vmatpush3.bf16.msra.mxu1 %v3000_v45 }
 0xcd5   : > { %2824 = vmatprep.subr.bf16.mxu1 %v3572_v3 }
 0xcd8   : > { %2825 = vmatpush3.bf16.msra.mxu1 %v3001_v46 }
 0xcd9   : > { %2826 = vmatprep.subr.bf16.mxu1 %v3572_v3 }
 0xcdc   : > { %2827 = vmatpush3.bf16.msra.mxu1 %v3002_v47 }
 0xcdd   : > { %2828 = vmatprep.subr.bf16.mxu1 %v3572_v3 }
 0xce0   : > { %2829 = vmatpush3.bf16.msra.mxu1 %v3003_v48 }
 0xda6   : > { %v2005_v7 = vpop.f32.mrb[32].mxu1 }
 0xda7   : > { %v2006_v8 = vadd.f32 %v2629_v4, %v2005_v7  ;;  %v2812_v9 = vpop.f32.mrb[33].mxu1 }
 0xda8   : > { %v2008_v10 = vpop.f32.mrb[34].mxu1 }
 0xda9   : > { %v2009_v12 = vadd.f32 %v2629_v4, %v2008_v10  ;;  %v2813_v14 = vpop.f32.mrb[35].mxu1  ;;  %v2012_v15 = vadd.f32 %v2006_v8, %v4199_v5 }
 0xdaa   : > { %v2639_v14 = vld [vmem:[%s787_s14] ss:$0 sm:$0xff] }
 0xdab   : > { %v2016_v18 = vsel %vm954_vm2, %v2012_v15, 0.0  ;;  %v2013_v19 = vadd.f32 %v2009_v12, %v4201_v6  ;;  %v2998_v6 = vld [vmem:[%s762_s19] sm:$0xff]  }
 0xdac   : > { %2017 = vadd.xlane.f32.xlu0 %v2016_v18  ;;  %2815 = vmatpush3.bf16.msra.mxu0 %v2998_v6 }
 0xdad   : > { %v2019_v20 = vsel %vm954_vm2, %v2013_v19, 0.0  ;;  %2816 = vmatprep.subr.bf16.mxu0 %v3572_v3 }
 0xdae   : > { %2020 = vadd.xlane.f32.xlu1 %v2019_v20 }
 0xdb0   : > { %2817 = vmatpush3.bf16.msra.mxu0 %v2999_v34 }
 0xe39   : > { %v2018_v21 = vpop.xlane.xlu0 %2017 }
 0xe3a   : > { %v2023_v22 = vmul.f32 0.03125, %v2018_v21 }
 0xe3b   : > { %v2021_v23 = vpop.xlane.xlu1 %2020 }
 0xe3c   : > { %v2025_v24 = vsub.f32 %v2012_v15, %v2023_v22  ;;  %v2024_v25 = vmul.f32 0.03125, %v2021_v23 }
 0xe3e   : > { %v2026_v26 = vsub.f32 %v2013_v19, %v2024_v25  ;;  %v2027_v27 = vmul.f32 %v2025_v24, %v2025_v24 }
 0xe40   : > { %v2029_v28 = vsel %vm954_vm2, %v2027_v27, 0.0  ;;  %v2028_v5 = vmul.f32 %v2026_v26, %v2026_v26 }
 0xe41   : > { %2030 = vadd.xlane.f32.xlu0 %v2029_v28 }
 0xe42   : > { %v2032_v29 = vsel %vm954_vm2, %v2028_v5, 0.0 }
 0xe45   : > { %2033 = vadd.xlane.f32.xlu0 %v2032_v29 }
 0xece   : > { %v2031_v30 = vpop.xlane.xlu0 %2030 }
 0xecf   : > { %v2035_v31 = vmul.f32 0.03125, %v2031_v30 }
 0xed1   : > { %v2037_v42 = vadd.f32 1e-12, %v2035_v31 }
 0xed2   : > { %v2034_v32 = vpop.xlane.xlu0 %2033 }
 0xed3   : > { %3036 = vrsqrt.f32 %v2037_v42  ;;  %v2036_v33 = vmul.f32 0.03125, %v2034_v32 }
 0xed5   : > { %v2038_v35 = vadd.f32 1e-12, %v2036_v33 }
 0xed7   : > { %3038 = vrsqrt.f32 %v2038_v35 }
 0xedd   : > { %v3037_v13 = vpop.eup %3036 }
 0xede   : > { %v2041_v11 = vmul.f32 %v3037_v13, %v2025_v24 }
 0xee0   : > { %v2049_v37 = vmul.f32 %v2633_v17, %v2041_v11 }
 0xee1   : > { %v3039_v36 = vpop.eup %3038 }
 0xee2   : > { %v2042_v38 = vmul.f32 %v3039_v36, %v2026_v26  ;;  %v2057_v41 = vadd.f32 %v2634_v39, %v2049_v37 }
 0xee4   : > { %v2050_v40 = vmul.f32 %v2633_v17, %v2042_v38  ;;  %v2645_v38 = vld [vmem:[%s795_s2] ss:$0 sm:$0xff] }
 0xee6   : > { %v2058_v43 = vadd.f32 %v2634_v39, %v2050_v40 }
 0xee8   : > { %v2059_v44 = vpack.c.bf16 %v2058_v43, %v2057_v41 }
 0xeea   : > { %2819 = vmatmul.mubr.msk.bf16.vlgmr.msra.gmra.mrb[36].mxu0 %vm954_vm2, %v2059_v44 }
 0xfbd   : > { %v2120_v16 = vpop.f32.mrb[36].mxu0 }
 0xfbe   : > { %v2121_v50 = vadd.f32 %v2635_v49, %v2120_v16  ;;  %v2820_v51 = vpop.f32.mrb[37].mxu0 }
 0xfbf   : > { %v2123_v52 = vpop.f32.mrb[38].mxu0 }
 0xfc0   : > { %v2129_v53 = vmul.f32 0.044715, %v2121_v50  ;;  %v2124_v54 = vadd.f32 %v2635_v49, %v2123_v52  ;;  %v2821_v55 = vpop.f32.mrb[39].mxu0  ;;  %v2127_v4 = vmul.f32 0.5, %v2121_v50 }
 0xfc2   : > { %v2131_v56 = vmul.f32 %v2129_v53, %v2121_v50  ;;  %v2130_v57 = vmul.f32 0.044715, %v2124_v54  ;;  %v2128_v7 = vmul.f32 0.5, %v2124_v54 }
 0xfc4   : > { %v2133_v58 = vmul.f32 %v2131_v56, %v2121_v50  ;;  %v2132_v59 = vmul.f32 %v2130_v57, %v2124_v54 }
 0xfc6   : > { %v2135_v60 = vadd.f32 %v2133_v58, %v2121_v50  ;;  %v2134_v61 = vmul.f32 %v2132_v59, %v2124_v54 }
 0xfc8   : > { %v2137_v62 = vmul.f32 0.7978846, %v2135_v60  ;;  %v2136_v63 = vadd.f32 %v2134_v61, %v2124_v54 }
 0xfca   : > { %3040 = vtanh.f32 %v2137_v62  ;;  %v2138_v3 = vmul.f32 0.7978846, %v2136_v63 }
 0xfcc   : > { %3042 = vtanh.f32 %v2138_v3 }
 0xfd4   : > { %v3041_v0 = vpop.eup %3040 }
 0xfd5   : > { %v2141_v1 = vadd.f32 1.0, %v3041_v0 }
 0xfd6   : > { %v3043_v2 = vpop.eup %3042 }
 0xfd7   : > { %v2142_v8 = vadd.f32 1.0, %v3043_v2  ;;  %v2143_v9 = vmul.f32 %v2141_v1, %v2127_v4 }
 0xfd9   : > { %v2144_v10 = vmul.f32 %v2142_v8, %v2128_v7 }
 0xfdb   : > { %v2145_v12 = vpack.c.bf16 %v2144_v10, %v2143_v9 }
 0xfdd   : > { %2831 = vmatmul.mubr.msk.bf16.vlgmr.msra.gmra.mrb[36].mxu1 %vm2185_vm8, %v2145_v12 }
0x10b0   : > { %v2223_v15 = vpop.f32.mrb[36].mxu1 }
0x10b1   : > { %v2224_v18 = vadd.f32 %v2639_v14, %v2223_v15  ;;  %v2832_v19 = vpop.f32.mrb[37].mxu1 }
0x10b2   : > { %v2226_v20 = vpop.f32.mrb[38].mxu1 }
0x10b3   : > { %v2227_v21 = vadd.f32 %v2639_v14, %v2226_v20  ;;  %v2833_v22 = vpop.f32.mrb[39].mxu1  ;;  %v2230_v23 = vadd.f32 %v2224_v18, %v2057_v41  ;;  %v2646_v41 = vld [vmem:[%s803_s4] ss:$0 sm:$0xff] }
0x10b5   : > { %v2234_v24 = vsel %vm954_vm2, %v2230_v23, 0.0  ;;  %v2231_v25 = vadd.f32 %v2227_v21, %v2058_v43 }
0x10b6   : > { %2235 = vadd.xlane.f32.xlu1 %v2234_v24 }
0x10b7   : > { %v2237_v26 = vsel %vm954_vm2, %v2231_v25, 0.0 }
0x10b8   : > { %2238 = vadd.xlane.f32.xlu0 %v2237_v26 }
0x1143   : > { %v2236_v27 = vpop.xlane.xlu1 %2235 }
0x1144   : > { %v2240_v28 = vmul.f32 0.03125, %v2236_v27 }
0x1145   : > { %v2239_v5 = vpop.xlane.xlu0 %2238 }
0x1146   : > { %v2242_v29 = vsub.f32 %v2230_v23, %v2240_v28  ;;  %v2241_v6 = vmul.f32 0.03125, %v2239_v5 }
0x1148   : > { %v2243_v34 = vsub.f32 %v2231_v25, %v2241_v6  ;;  %v2244_v30 = vmul.f32 %v2242_v29, %v2242_v29 }
0x114a   : > { %v2246_v31 = vsel %vm954_vm2, %v2244_v30, 0.0  ;;  %v2245_v42 = vmul.f32 %v2243_v34, %v2243_v34 }
0x114b   : > { %2247 = vadd.xlane.f32.xlu1 %v2246_v31 }
0x114c   : > { %v2249_v32 = vsel %vm954_vm2, %v2245_v42, 0.0 }
0x114d   : > { %2250 = vadd.xlane.f32.xlu0 %v2249_v32 }
0x11d8   : > { %v2248_v33 = vpop.xlane.xlu1 %2247 }
0x11d9   : > { %v2252_v35 = vmul.f32 0.03125, %v2248_v33 }
0x11da   : > { %v2251_v13 = vpop.xlane.xlu0 %2250 }
0x11db   : > { %v2254_v11 = vadd.f32 1e-12, %v2252_v35  ;;  %v2253_v17 = vmul.f32 0.03125, %v2251_v13 }
0x11dd   : > { %3044 = vrsqrt.f32 %v2254_v11  ;;  %v2255_v36 = vadd.f32 1e-12, %v2253_v17 }
0x11df   : > { %3046 = vrsqrt.f32 %v2255_v36 }
0x11e7   : > { %v3045_v37 = vpop.eup %3044 }
0x11e8   : > { %v2258_v39 = vmul.f32 %v3045_v37, %v2242_v29 }
0x11e9   : > { %v3047_v40 = vpop.eup %3046 }
0x11ea   : > { %v2266_v43 = vmul.f32 %v2645_v38, %v2258_v39  ;;  %v2259_v44 = vmul.f32 %v3047_v40, %v2243_v34  ;;  %2281 = sbr.rel (%p2647_p8) target bundleno = 4593 (0x11f1), region = 140 }
0x11ec   : > { %v2274_v45 = vadd.f32 %v2646_v41, %v2266_v43  ;;  %v2267_v46 = vmul.f32 %v2645_v38, %v2259_v44 }
0x11ee   : > { %2276 = vst.msk [vmem:[#allocation2] sm:$0xff] %vm954_vm2, %v2274_v45  ;;  %v2275_v47 = vadd.f32 %v2646_v41, %v2267_v46  ;;  %2282 = vst.msk [vmem:[#allocation21] sm:$0xff] (!%p2647_p8), %vm954_vm2, %v2274_v45 }
0x11f0   : > { %2277 = vst.msk [vmem:[#allocation2 + $0x8] sm:$0xff] %vm954_vm2, %v2275_v47  ;;  %2283 = vst.msk [vmem:[#allocation21 + $0x8] sm:$0xff] (!%p2647_p8), %vm954_vm2, %v2275_v47 }
0x11f1 PF: > { %s4567_s16 = sld [smem:[#allocation30_spill]]  ;;  %s3589_s30 = smov [#allocation21]  }
0x11f2   : > { %s2293_s23 = sshll.u32 %s3589_s30, 4  ;;  %s2294_s23 = int_to_ptr.vmem [resolvable:$true] %s2293_s23 }
0x11f3   : > { %s3464_s1 = scalar_lea.vmem %s2294_s23, 256  ;;  %p3471_p3 = scmp.lt.s32.totalorder %s2294_s23, %s2294_s23 }
0x11f4   : > { %p3465_p2 = scmp.ne.s32.totalorder %s2294_s23, %s3464_s1  ;;  %p3472_p6 = scmp.lt.s32.totalorder %s3464_s1, %s3464_s1 }
0x11f6   : > { %p3473_p11 = por %p3472_p6, %p3471_p3 }
0x11f7   : > { %p2919_p0 = scmp.eq.s32.totalorder %s4567_s16, 1 }
0x11f9   : > { %p3466_p4 = pnand %p3465_p2, %p2919_p0 }
0x11fb   : > { %p3467_p13 = pneg %p3466_p4 }
0x11fd   : > { %p3474_p5 = pnand %p3473_p11, %p3467_p13 }
0x11ff   : > { %3477 = shalt.err (!%p3474_p5)
}
0x1200   : > { %s4568_s28 = sld [smem:[#allocation43_spill]] }
0x1206   : > { %s3478_s0 = scalar_lea.hbm %s4568_s28, 256 }
0x1207   : > { %p3479_p10 = scmp.ne.s32.totalorder %s4568_s28, %s3478_s0  ;;  %p3484_p9 = scmp.lt.u32.totalorder %s3478_s0, %s4568_s28 }
0x1209   : > { %p3480_p7 = pnand %p3479_p10, %p2919_p0 }
0x120b   : > { %p3481_p1 = pneg %p3480_p7 }
0x120d   : > { %p3486_p12 = pnand %p3484_p9, %p3481_p1 }
0x120f   : > { %3489 = shalt.err (!%p3486_p12)
}
0x1210   : > { %s3590_s27 = smov 128  }
0x1211   : > { %2867 = dma.vmem_to_hbm [thread:$0]  (%p2919_p0), %s2294_s23, 256, %s4568_s28, [#allocation6], %s3590_s27, %s3590_s27, %s3586_s24  }
0x1212   : > { %3527 = dma.done.wait (%p2919_p0), [#allocation6], 256  }
0x1213   : > { %3529 = vsyncadd (%p2919_p0), [#allocation6], 4294967040 }
0x1214 PF: > { %s4569_s12 = sld [smem:[#allocation29_spill]]  ;;  %s4570_s29 = sld [smem:[#allocation26_spill]] }
0x1215   : > { %s4571_s30 = sld [smem:[#allocation27_spill]]  ;;  %s4572_s15 = sld [smem:[#allocation35_spill]] }
0x1216   : > { %s4573_s21 = sld [smem:[#allocation34_spill]]  ;;  %s4574_s16 = smov %s3548_s17 }
0x121a   : > { %s27_s18 = sadd.s32 1, %s4569_s12  }
0x121b   : > { %p24_p8 = scmp.ge.s32.totalorder %s27_s18, 4  }
0x121c   : > { %s4575_s17 = smov %s4573_s21 }
0x121d   :  { %26 = sbr.rel (!%p24_p8) target bundleno = 14 (0xe), region = 252 }
0x1224   :  { %2309 = vsyncpa [#allocation5], 1 }
0x1225   :  { %2311 = vsyncpa [#allocation5 + $0x1], 1 }
0x1226   :  { %2312 = vsyncpa [#allocation8], 1 }
0x1227   :  { %2313 = vsyncpa [#allocation6], 1 }
0x1228   :  { %2315 = vsyncpa [#allocation6 + $0x1], 1 }

</bundles_post_ra>
